<compile_context>
chip_gen: v7x
topology: tpu7x:2x2x1
jax: 0.10.0
libtpu: 0.0.40
codegen_flags: <defaults>
</compile_context>

<pallas_src>
import jax
import jax.numpy as jnp
from jax.experimental import pallas as pl
from jax.experimental.pallas import tpu as pltpu


_LANE = 128
_SUBLANE = 8
_TARGET_X_TILE_BYTES = 4 * 1024 * 1024   # per-step x tile target (1-4 MiB sweet spot)
_FUSED_W1_VMEM_LIMIT = 8 * 1024 * 1024   # max VMEM for the pool-folded fc1 weight


def _round_up(n, m):
    return (n + m - 1) // m * m


def se_kernel_fused(x_ref, w1b_ref, w2t_ref, y_ref):
    """Squeeze + fc1 fused into one MXU contraction (no XLU lane-reduce).

    x_ref  : (tb, C*HW)   lane-dense input tile (native dtype)
    w1b_ref: (Cr, C*HW)   fc1 weight with the 1/HW avg-pool folded in
    w2t_ref: (Cr, C_pad)  fc2 weight, pre-transposed + zero-padded to lane width
    y_ref  : (tb, C_pad)  HSigmoid excitation, lane-dense f32 output slab
    """
    # h[b, r] = sum_{c,hw} x[b, c*HW+hw] * w1[r, c] / HW   (MXU, f32 accumulate)
    h = jax.lax.dot_general(
        x_ref[...], w1b_ref[...],
        dimension_numbers=(((1,), (1,)), ((), ())),
        preferred_element_type=jnp.float32)
    h = jnp.maximum(h, 0.0)                                               # ReLU
    s = jnp.dot(h, w2t_ref[...], preferred_element_type=jnp.float32)      # (tb, C_pad)
    y_ref[...] = (jnp.clip(s + 3.0, 0.0, 6.0) * (1.0 / 6.0)).astype(y_ref.dtype)


def se_kernel_reduce(x_ref, w1_ref, w2t_ref, y_ref):
    """Fallback when the pool-folded fc1 weight would not fit VMEM.

    Squeeze is a lane-axis reduce (XLU); only used for very large C*HW*Cr.
    # TODO(synk): replace with an HW-chunked MXU accumulation for huge SE blocks.
    """
    x = x_ref[...].astype(jnp.float32)                    # (tb, C, HW)
    pooled = jnp.sum(x, axis=2) * (1.0 / x_ref.shape[2])  # (tb, C)
    h = jax.lax.dot_general(
        pooled, w1_ref[...],
        dimension_numbers=(((1,), (1,)), ((), ())),
        preferred_element_type=jnp.float32)
    h = jnp.maximum(h, 0.0)
    s = jnp.dot(h, w2t_ref[...], preferred_element_type=jnp.float32)
    y_ref[...] = (jnp.clip(s + 3.0, 0.0, 6.0) * (1.0 / 6.0)).astype(y_ref.dtype)


def _choose_tb(batch, row_vmem_bytes):
    """Batch tile: multiple of 8, ~_TARGET_X_TILE_BYTES of x per tile, and at
    least 2 grid steps when the batch allows (v7x 2-TC megacore)."""
    b8 = _round_up(batch, _SUBLANE)
    tb = max(_SUBLANE,
             (_TARGET_X_TILE_BYTES // max(row_vmem_bytes, 1)) // _SUBLANE * _SUBLANE)
    tb = min(tb, b8)
    if tb >= b8 and b8 >= 2 * _SUBLANE:
        tb = max(_SUBLANE, (b8 // 2) // _SUBLANE * _SUBLANE)
    return tb


def se_forward(x, w1, w2):
    """SE forward.

    x : (B, C, H, W);  w1: (C//r, C), w2: (C, C//r)  (PyTorch Linear, bias=False)

    Returns (x, y): the module's forward returns x unchanged (passthrough is
    handled purely in the wrapper; x never round-trips HBM->VMEM->HBM); y is
    the excitation vector, computed-but-unused in the reference, returned here
    for verification.
    """
    B, C, H, W = x.shape
    HW = H * W
    Cr = w1.shape[0]
    C_pad = _round_up(C, _LANE)
    x_itemsize = jnp.dtype(x.dtype).itemsize

    # fc2 weight: pre-transposed, zero-padded to a lane-dense (Cr, C_pad) tile.
    # Padded columns yield hsigmoid(3) = 0.5, sliced away below.
    w2t_pad = jnp.zeros((Cr, C_pad), jnp.float32).at[:, :C].set(w2.T.astype(jnp.float32))

    # Decide whether the avg-pool can be folded into fc1 as one MXU contraction.
    w1b_vmem = _round_up(Cr, _SUBLANE) * _round_up(C * HW, _LANE) * x_itemsize
    fused = w1b_vmem <= _FUSED_W1_VMEM_LIMIT

    if fused:
        # Lane-dense 2D view of x (free reshape; NCHW is contiguous).  Avoids
        # per-channel lane padding when HW is not a multiple of 128.
        x_in = x.reshape(B, C * HW)
        row_vmem = _round_up(C * HW, _LANE) * x_itemsize
        # Fold 1/HW pooling into fc1: column c*HW+hw of w1b is w1[:, c] / HW.
        w1_in = (jnp.repeat(w1.astype(jnp.float32), HW, axis=1) * (1.0 / HW)
                 ).astype(x.dtype)                      # (Cr, C*HW)
        kernel = se_kernel_fused
        x_spec = pl.BlockSpec((None, C * HW)[1:] and (0, 0) or None)  # placeholder (unused)
        x_spec = pl.BlockSpec((0, 0))  # placeholder (overwritten below)
        x_spec = pl.BlockSpec((1, 1), lambda i: (i, 0))  # placeholder (overwritten below)
    else:
        x_in = x.reshape(B, C, HW)
        row_vmem = _round_up(C, _SUBLANE) * _round_up(HW, _LANE) * x_itemsize
        w1_in = w1.astype(jnp.float32)                  # (Cr, C)
        kernel = se_kernel_reduce

    tb = _choose_tb(B, row_vmem)
    B_pad = _round_up(B, tb)
    if B_pad != B:
        pad = [(0, B_pad - B)] + [(0, 0)] * (x_in.ndim - 1)
        x_in = jnp.pad(x_in, pad)
    grid = (B_pad // tb,)

    if fused:
        x_spec = pl.BlockSpec((tb, C * HW), lambda i: (i, 0))
        w1_spec = pl.BlockSpec((Cr, C * HW), lambda i: (0, 0))
        w1_vmem = w1b_vmem
    else:
        x_spec = pl.BlockSpec((tb, C, HW), lambda i: (i, 0, 0))
        w1_spec = pl.BlockSpec((Cr, C), lambda i: (0, 0))
        w1_vmem = _round_up(Cr, _SUBLANE) * _round_up(C, _LANE) * 4
    w2_spec = pl.BlockSpec((Cr, C_pad), lambda i: (0, 0))
    y_spec = pl.BlockSpec((tb, C_pad), lambda i: (i, 0))

    # VMEM budget derived from actual (double-buffered) footprints + slack.
    # Tile targets keep this well under v7x's 64 MiB physical VMEM.
    w2_vmem = _round_up(Cr, _SUBLANE) * C_pad * 4
    y_vmem = tb * C_pad * 4
    need = 2 * (tb * row_vmem + w1_vmem + w2_vmem + y_vmem) + (2 << 20)
    vmem_limit = int(min(max(need, 16 << 20), 100 << 20))

    y_pad = pl.pallas_call(
        kernel,
        out_shape=jax.ShapeDtypeStruct((B_pad, C_pad), jnp.float32),
        grid_spec=pltpu.PrefetchScalarGridSpec(
            num_scalar_prefetch=0,
            grid=grid,
            in_specs=[x_spec, w1_spec, w2_spec],
            out_specs=y_spec,
        ),
        compiler_params=pltpu.CompilerParams(
            # Independent batch tiles -> parallel (shards across v7x's 2 TCs;
            # no-op on single-TC v5e/v6e).
            dimension_semantics=("parallel",),
            vmem_limit_bytes=vmem_limit,
        ),
    )(x_in, w1_in, w2t_pad)

    y = y_pad[:B, :C].astype(x.dtype)
    # Module semantics: forward returns x untouched.
    return x, y


def se_reference(x, w1, w2):
    pooled = jnp.mean(x.astype(jnp.float32), axis=(2, 3))            # (B, C)
    h = jnp.maximum(
        jnp.dot(pooled, w1.T.astype(jnp.float32),
                precision=jax.lax.Precision.HIGHEST), 0.0)           # (B, Cr)
    s = jnp.dot(h, w2.T.astype(jnp.float32),
                precision=jax.lax.Precision.HIGHEST)                 # (B, C)
    y = jnp.clip(s + 3.0, 0.0, 6.0) / 6.0
    return x, y


if __name__ == "__main__":
    key = jax.random.PRNGKey(0)
    B, C, H, W = 16, 64, 16, 16
    reduction = 4
    Cr = C // reduction

    kx, k1, k2 = jax.random.split(key, 3)
    x = jax.random.normal(kx, (B, C, H, W), dtype=jnp.float32)
    # PyTorch Linear layout: (out_features, in_features), bias=False
    w1 = jax.random.normal(k1, (Cr, C), dtype=jnp.float32) * 0.1
    w2 = jax.random.normal(k2, (C, Cr), dtype=jnp.float32) * 0.1

    out, y = se_forward(x, w1, w2)
    out = jax.block_until_ready(out)
    y = jax.block_until_ready(y)

    ref_out, ref_y = se_reference(x, w1, w2)
    assert jnp.allclose(out, ref_out), "passthrough mismatch"
    assert jnp.allclose(y, ref_y, atol=1e-4, rtol=1e-4), "excitation mismatch"

    print("KERNEL_OK")
</pallas_src>

<mosaic_0001>
module attributes {stable_mosaic.version = 11 : i64} {
  func.func @se_kernel_fused(%arg0: i32, %arg1: memref<8x16384xf32, #tpu.memory_space<vmem>>, %arg2: memref<16x16384xf32, #tpu.memory_space<vmem>>, %arg3: memref<16x128xf32, #tpu.memory_space<vmem>>, %arg4: memref<8x128xf32, #tpu.memory_space<vmem>>) attributes {dimension_semantics = [#tpu.dimension_semantics<parallel>], iteration_bounds = array<i64: 2>, scalar_prefetch = 0 : i64, scratch_operands = 0 : i64, tpu.core_type = #tpu.core_type<tc>, window_params = [{transform_indices = @transform_0, window_bounds = array<i64: 8, 16384>}, {pipeline_mode = #tpu.pipeline_mode<synchronous>, transform_indices = @transform_1, window_bounds = array<i64: 16, 16384>}, {pipeline_mode = #tpu.pipeline_mode<synchronous>, transform_indices = @transform_2, window_bounds = array<i64: 16, 128>}, {transform_indices = @transform_3, window_bounds = array<i64: 8, 128>}]} {
    %c0 = arith.constant 0 : index
    %c0_0 = arith.constant 0 : index
    %0 = vector.load %arg1[%c0, %c0_0] : memref<8x16384xf32, #tpu.memory_space<vmem>>, vector<8x16384xf32>
    %c0_1 = arith.constant 0 : index
    %c0_2 = arith.constant 0 : index
    %1 = vector.load %arg2[%c0_1, %c0_2] : memref<16x16384xf32, #tpu.memory_space<vmem>>, vector<16x16384xf32>
    %cst = arith.constant dense<0.000000e+00> : vector<8x16xf32>
    %2 = tpu.matmul %0, %1, %cst {dimension_numbers = #tpu.dot_dimension_numbers<[1], [1], [0], [0], [0, 0, 1, 0], [], []>} : vector<8x16384xf32>, vector<16x16384xf32>, vector<8x16xf32> -> vector<8x16xf32>
    %cst_3 = arith.constant 0.000000e+00 : f32
    %3 = vector.broadcast %cst_3 : f32 to vector<8x16xf32>
    %4 = arith.maximumf %2, %3 : vector<8x16xf32>
    %c0_4 = arith.constant 0 : index
    %c0_5 = arith.constant 0 : index
    %5 = vector.load %arg3[%c0_4, %c0_5] : memref<16x128xf32, #tpu.memory_space<vmem>>, vector<16x128xf32>
    %cst_6 = arith.constant dense<0.000000e+00> : vector<8x128xf32>
    %6 = tpu.matmul %4, %5, %cst_6 {dimension_numbers = #tpu.dot_dimension_numbers<[1], [0], [0], [1], [0, 0, 1, 1], [], []>} : vector<8x16xf32>, vector<16x128xf32>, vector<8x128xf32> -> vector<8x128xf32>
    %cst_7 = arith.constant 3.000000e+00 : f32
    %7 = vector.broadcast %cst_7 : f32 to vector<8x128xf32>
    %8 = arith.addf %6, %7 : vector<8x128xf32>
    %cst_8 = arith.constant 0.000000e+00 : f32
    %cst_9 = arith.constant 6.000000e+00 : f32
    %9 = vector.broadcast %cst_8 : f32 to vector<8x128xf32>
    %10 = arith.maximumf %9, %8 : vector<8x128xf32>
    %11 = vector.broadcast %cst_9 : f32 to vector<8x128xf32>
    %12 = arith.minimumf %11, %10 : vector<8x128xf32>
    %cst_10 = arith.constant 0.166666672 : f32
    %13 = vector.broadcast %cst_10 : f32 to vector<8x128xf32>
    %14 = arith.mulf %12, %13 : vector<8x128xf32>
    %c0_11 = arith.constant 0 : index
    %c0_12 = arith.constant 0 : index
    %15 = vector.load %arg4[%c0_11, %c0_12] : memref<8x128xf32, #tpu.memory_space<vmem>>, vector<8x128xf32>
    tpu.vector_store %arg4[%c0_11, %c0_12], %14 {strides = array<i32>} : memref<8x128xf32, #tpu.memory_space<vmem>>, vector<8x128xf32>,
    return
  }
  func.func @transform_0(%arg0: i32) -> (i32, i32) {
    %c0_i32 = arith.constant 0 : i32
    %c0_i32_0 = arith.constant 0 : i32
    return %arg0, %c0_i32 : i32, i32
  }
  func.func @transform_1(%arg0: i32) -> (i32, i32) {
    %c0_i32 = arith.constant 0 : i32
    %c0_i32_0 = arith.constant 0 : i32
    %c0_i32_1 = arith.constant 0 : i32
    return %c0_i32, %c0_i32_0 : i32, i32
  }
  func.func @transform_2(%arg0: i32) -> (i32, i32) {
    %c0_i32 = arith.constant 0 : i32
    %c0_i32_0 = arith.constant 0 : i32
    %c0_i32_1 = arith.constant 0 : i32
    return %c0_i32, %c0_i32_0 : i32, i32
  }
  func.func @transform_3(%arg0: i32) -> (i32, i32) {
    %c0_i32 = arith.constant 0 : i32
    %c0_i32_0 = arith.constant 0 : i32
    return %arg0, %c0_i32 : i32, i32
  }
}

</mosaic_0001>

<bundles_post_ra>
// kernel: tpu_custom_call.1
= control target key start
LH: loop header
LB: loop body
LE: loop exit
PB: predicated region body
PF: predicated region fallthrough
CT: control target
= control target key end

     0   :  { %8 = vsyncpa [#allocation3], 0  ;;  %s6300_s0 = inlined_call_operand.hbm [shape: f32[16,16384], index: 0, kind: input, shape index: {}]   ;;  %s6301_s1 = inlined_call_operand.hbm [shape: f32[16,16384], index: 1, kind: input, shape index: {}]   ;;  %s6302_s2 = inlined_call_operand.hbm [shape: f32[16,128], index: 2, kind: input, shape index: {}]   ;;  %s6303_s3 = inlined_call_operand.hbm [shape: f32[16,128], index: 3, kind: output, shape index: {}]  }
   0x1   :  { %10 = vsyncpa [#allocation3 + $0x1], 0 }
   0x2   :  { %11 = vsyncpa [#allocation6], 0 }
   0x3   :  { %12 = vsyncpa [#allocation4], 0 }
   0x4   :  { %14 = vsyncpa [#allocation4 + $0x1], 0  ;;  %s5940_s12 = smov 0   ;;  %s5942_s13 = smov 0  }
   0x5   :  { %s5944_s14 = smov 0   ;;  %s5946_s15 = smov 0  }
   0x6 LB: > { %s5961_s16 = sadd.s32 4294967295, %s5907_s15   ;;  %s5264_s17 = sadd.s32 4294967294, %s5907_s15   ;;  %s5907_s15 = sphi %s5946_s15, %s6323_s15   ;;  %s5903_s14 = sphi %s5944_s14, %s6322_s14   ;;  %s5899_s13 = sphi %s5942_s13, %s6321_s13   ;;  %s5895_s12 = sphi %s5940_s12, %s6320_s12  }
   0x7   : > { %p40_p0 = scmp.ne.s32.totalorder %s5899_s13, %s5895_s12  ;;  %p6304_p1 = scmp.eq.s32.totalorder %s5961_s16, 0 }
   0x8   : > { %p112_p3 = scmp.eq.s32.totalorder %s5264_s17, 1  ;;  %p5265_p5 = scmp.ge.s32.totalorder %s5907_s15, 1 }
   0x9   : > { %p5970_p4 = por %p6304_p1, %p40_p0  ;;  %p119_p7 = scmp.lt.s32.totalorder %s5907_s15, 3 }
   0xa   : > { %p5975_p6 = por %p112_p3, %p40_p0  ;;  %s5909_s21 = smov [#allocation5]  }
   0xb   : > { %s6307_s18 = scalar_select %p5970_p4, 1, 0 }
   0xc   : > { %s6308_s19 = scalar_select %p5975_p6, 1, 0 }
   0xd   : > { %p5980_p8 = pnand %p5265_p5, %p119_p7  ;;  %s131_s22 = sshll.u32 %s5909_s21, 4  ;;  %s5984_s22 = int_to_ptr.vmem [resolvable:$true] %s131_s22 }
   0xe   : > { %s5910_s24 = smov [#allocation7]   ;;  %s5751_s28 = scalar_lea.hbm %s6301_s1, 32768 }
   0xf   : > { %p5689_p9 = pneg %p5980_p8  ;;  %s144_s25 = sshll.u32 %s5910_s24, 4  ;;  %s5995_s25 = int_to_ptr.vmem [resolvable:$true] %s144_s25 }
  0x10   : > { %p5752_p12 = scmp.ne.s32.totalorder %s6301_s1, %s5751_s28  ;;  %p5758_p5 = scmp.lt.u32.totalorder %s5751_s28, %s6301_s1 }
  0x11   : > { %p5991_p11 = pnand %p5689_p9, %p6304_p1 }
  0x13   : > { %p5753_p13 = pneg %p5991_p11 }
  0x15   : > { %p5754_p0 = pnand %p5753_p13, %p5752_p12 }
  0x17   : > { %p5755_p3 = pneg %p5754_p0 }
  0x19   : > { %p5760_p7 = pnand %p5758_p5, %p5755_p3 }
  0x1b   : > { %5763 = shalt.err (!%p5760_p7)
}
  0x1c   : > { %s5764_s6 = scalar_lea.vmem %s5984_s22, 32768  ;;  %p5772_p2 = scmp.lt.s32.totalorder %s5984_s22, %s5984_s22 }
  0x1d   : > { %p5765_p9 = scmp.ne.s32.totalorder %s5984_s22, %s5764_s6  ;;  %p5773_p12 = scmp.lt.s32.totalorder %s5764_s6, %s5764_s6 }
  0x1f   : > { %p5767_p10 = pnand %p5765_p9, %p5753_p13  ;;  %p5774_p0 = por %p5773_p12, %p5772_p2 }
  0x21   : > { %p5768_p1 = pneg %p5767_p10 }
  0x23   : > { %p5775_p6 = pnand %p5774_p0, %p5768_p1 }
  0x25   : > { %5778 = shalt.err (!%p5775_p6)
}
  0x26   : > { %s5911_s7 = smov 16384   ;;  %s5912_s8 = smov 1024  }
  0x27   : > { %5692 = dma.hbm_to_vmem [thread:$0]  (!%p5991_p11), %s6301_s1, 32768, %s5984_s22, [#allocation6], %s5911_s7, %s5911_s7, %s5912_s8  }
  0x28   : > { %s5779_s21 = scalar_lea.hbm %s6302_s2, 256 }
  0x29   : > { %p5780_p2 = scmp.ne.s32.totalorder %s6302_s2, %s5779_s21  ;;  %p5786_p10 = scmp.lt.u32.totalorder %s5779_s21, %s6302_s2 }
  0x2b   : > { %p5782_p1 = pnand %p5780_p2, %p5753_p13 }
  0x2d   : > { %p5783_p6 = pneg %p5782_p1 }
  0x2f   : > { %p5788_p3 = pnand %p5786_p10, %p5783_p6 }
  0x31   : > { %5791 = shalt.err (!%p5788_p3)
}
  0x32   : > { %s5792_s22 = scalar_lea.vmem %s5995_s25, 256  ;;  %p5800_p12 = scmp.lt.s32.totalorder %s5995_s25, %s5995_s25 }
  0x33   : > { %p5793_p5 = scmp.ne.s32.totalorder %s5995_s25, %s5792_s22  ;;  %p5801_p0 = scmp.lt.s32.totalorder %s5792_s22, %s5792_s22 }
  0x35   : > { %p5795_p7 = pnand %p5793_p5, %p5753_p13  ;;  %p5802_p2 = por %p5801_p0, %p5800_p12 }
  0x37   : > { %p5796_p9 = pneg %p5795_p7 }
  0x39   : > { %p5803_p1 = pnand %p5802_p2, %p5796_p9 }
  0x3b   : > { %5806 = shalt.err (!%p5803_p1)
}
  0x3c   : > { %s5913_s29 = smov 128   ;;  %s5914_s30 = smov 8  }
  0x3d   : > { %5695 = dma.hbm_to_vmem [thread:$0]  (!%p5991_p11), %s6302_s2, 256, %s5995_s25, [#allocation6], %s5913_s29, %s5913_s29, %s5914_s30  }
  0x3e   : > { %s6050_s6 = sadd.s32 1, %s5907_s15   ;;  %s27_s8 = sadd.s32 1, %s5903_s14 }
  0x3f   : > { %s24_s7 = ssub.s32 %s5907_s15, %s6050_s6  ;;  %p34_p6 = scmp.ne.s32.totalorder %s5903_s14, %s5899_s13 }
  0x40   : > { %p25_p13 = scmp.eq.s32.totalorder %s24_s7, 0  ;;  %p35_p10 = scmp.eq.s32.totalorder %s5907_s15, 0 }
  0x41   : > { %p6311_p5 = scmp.eq.s32.totalorder %s5961_s16, 1  ;;  %p5706_p9 = scmp.lt.s32.totalorder %s5907_s15, 2 }
  0x42   : > { %s6059_s9 = scalar_select %p25_p13, %s5903_s14, %s27_s8  }
  0x43   : > { %p36_p3 = por %p35_p10, %p34_p6  ;;  %p6063_p7 = por %p6311_p5, %p34_p6 }
  0x44   : > { %s158_s23 = sand.u32 1, %s5903_s14   ;;  %s5282_s25 = sshll.u32 %s5907_s15, 14 }
  0x45   : > { %s6312_s10 = scalar_select %p6063_p7, 1, 0 }
  0x46   : > { %s5269_s11 = sshll.u32 %s158_s23, 10  ;;  %s6073_s24 = scalar_lea.hbm %s6300_s0, %s5282_s25 }
  0x47   : > { %s162_s26 = scalar_lea.vmem [#allocation2], %s5269_s11  ;;  %p6077_p11 = pnand %p5706_p9, %p36_p3 }
  0x48   : > { %s170_s27 = sshll.u32 %s162_s26, 4  ;;  %s159_s22 = scalar_lea.sflag [#allocation3], %s158_s23  ;;  %s6075_s27 = int_to_ptr.vmem [resolvable:$true] %s170_s27 }
  0x49   : > { %s5807_s29 = scalar_lea.hbm %s6073_s24, 16384  ;;  %p5809_p0 = pneg %p6077_p11 }
  0x4a   : > { %p5808_p12 = scmp.ne.s32.totalorder %s6073_s24, %s5807_s29  ;;  %s5812_s5 = scalar_lea.hbm %s6300_s0, 32768 }
  0x4b   : > { %p5813_p13 = scmp.lt.u32.totalorder %s6073_s24, %s6300_s0  ;;  %p5814_p6 = scmp.lt.u32.totalorder %s5812_s5, %s5807_s29 }
  0x4c   : > { %p5810_p2 = pnand %p5809_p0, %p5808_p12  ;;  %p5816_p3 = scmp.lt.u32.totalorder %s5807_s29, %s6073_s24 }
  0x4d   : > { %p5815_p10 = por %p5814_p6, %p5813_p13 }
  0x4e   : > { %p5811_p1 = pneg %p5810_p2 }
  0x4f   : > { %p5817_p5 = por %p5816_p3, %p5815_p10 }
  0x51   : > { %p5818_p9 = pnand %p5817_p5, %p5811_p1 }
  0x53   : > { %5821 = shalt.err (!%p5818_p9)
}
  0x54   : > { %s5822_s23 = scalar_lea.vmem %s6075_s27, 16384  ;;  %s5915_s11 = smov [#allocation2]  }
  0x55   : > { %p5823_p12 = scmp.ne.s32.totalorder %s6075_s27, %s5822_s23  ;;  %s5827_s25 = sshll.u32 %s5915_s11, 4  ;;  %s5828_s25 = int_to_ptr.vmem [resolvable:$false] %s5827_s25 }
  0x56   : > { %s5829_s17 = scalar_lea.vmem %s5828_s25, 32768  ;;  %p5830_p4 = scmp.lt.s32.totalorder %s6075_s27, %s5828_s25 }
  0x57   : > { %p5825_p2 = pnand %p5823_p12, %p5809_p0  ;;  %p5831_p13 = scmp.lt.s32.totalorder %s5829_s17, %s5822_s23 }
  0x59   : > { %p5826_p7 = pneg %p5825_p2  ;;  %p5832_p6 = por %p5831_p13, %p5830_p4 }
  0x5b   : > { %p5833_p10 = pnand %p5832_p6, %p5826_p7 }
  0x5d   : > { %5836 = shalt.err (!%p5833_p10)
}
  0x5e   : > { %5699 = dma.hbm_to_vmem [thread:$0]  (!%p6077_p11), %s6073_s24, 16384, %s6075_s27, %s159_s22  }
  0x5f   : > { %179 = sbr.rel (%p5980_p8) target bundleno = 818 (0x332), region = 32  ;;  %s6109_s21 = sand.u32 (!%p5980_p8), 1, %s5899_s13  }
  0x60   : > { %s5273_s26 = sshll.u32 (!%p5980_p8), %s6109_s21, 10  ;;  %s182_s29 = scalar_lea.sflag (!%p5980_p8), [#allocation3], %s6109_s21 }
  0x61   : > { %s6113_s30 = scalar_lea.vmem (!%p5980_p8), [#allocation2], %s5273_s26  ;;  %p6314_p4 = scmp.ne.s32.totalorder (!%p5980_p8), %s6307_s18, 0 }
  0x66   : > { %5882 = dma.done.wait (%p6314_p4), %s182_s29, 16384  }
  0x67   : > { %5884 = vsyncadd (%p6314_p4), %s182_s29, 4294950912  ;;  %p6315_p7 = scmp.eq.s32.totalorder %s5961_s16, 0 }
  0x69   : > { %5886 = dma.done.wait (%p6315_p7), [#allocation6], 33024   ;;  %p6316_p8 = pmov %p6315_p7 }
  0x6a   : > { %v345_v0 = vld [vmem:[#allocation5 + $0x8] sm:$0xff]  ;;  %v344_v5 = vld [vmem:[#allocation5] sm:$0xff]  ;;  %v347_v14 = vld [vmem:[#allocation5 + $0x18] sm:$0xff]  ;;  %vm5917_vm0 = vmmov 0   ;;  %vm5083_vm1 = vcmask 130048   ;;  %s5276_s18 = sshll.u32 %s6109_s21, 3 }
  0x6b   : > { %5888 = vsyncadd (%p6316_p8), [#allocation6], 4294934272  ;;  %v473_v1 = vld [vmem:[#allocation5 + $0x408] sm:$0xff]  ;;  %v472_v6 = vld [vmem:[#allocation5 + $0x400] sm:$0xff]  ;;  %s5279_s20 = sshll.u32 %s5961_s16, 7  ;;  %s215_s24 = scalar_lea.vmem [#allocation8], %s5276_s18 }
  0x6c   : > { %v409_v2 = vld [vmem:[#allocation5 + $0x208] sm:$0xff]  ;;  %v5293_v3 = vpack.c.bf16 %v473_v1, %v345_v0  ;;  %v5295_v8 = vpack.c.bf16 %v472_v6, %v344_v5  ;;  %v408_v9 = vld [vmem:[#allocation5 + $0x200] sm:$0xff]  ;;  %v475_v15 = vld [vmem:[#allocation5 + $0x418] sm:$0xff]  ;;  %s5175_s27 = sshll.u32 %s215_s24, 4  ;;  %s6256_s4 = scalar_lea.hbm %s6303_s3, %s5279_s20  ;;  %s6258_s27 = int_to_ptr.vmem [resolvable:$true] %s5175_s27 }
  0x6d   : > { %v537_v4 = vld [vmem:[#allocation5 + $0x608] sm:$0xff]  ;;  %v536_v10 = vld [vmem:[#allocation5 + $0x600] sm:$0xff]  ;;  %v411_v16 = vld [vmem:[#allocation5 + $0x218] sm:$0xff]  ;;  %v5297_v17 = vpack.c.bf16 %v475_v15, %v347_v14  ;;  %s5162_s5 = scalar_lea.sflag [#allocation4], %s6109_s21  ;;  %s5837_s7 = scalar_lea.vmem %s6258_s27, 128 }
  0x6e   : > { %v5421_v7 = vpack.c.bf16 %v537_v4, %v409_v2  ;;  %v217_v11 = vld [vmem:[%s6113_s30 + $0x8] sm:$0xff]  ;;  %5294 = vmatprep.subr.bf16.mxu1 %v5293_v3  ;;  %v5423_v12 = vpack.c.bf16 %v536_v10, %v408_v9  ;;  %v539_v18 = vld [vmem:[#allocation5 + $0x618] sm:$0xff]  ;;  %v346_v19 = vld [vmem:[#allocation5 + $0x10] sm:$0xff]  ;;  %p5838_p11 = scmp.ne.s32.totalorder %s6258_s27, %s5837_s7  ;;  %p6317_p0 = scmp.ne.s32.totalorder %s6312_s10, 0 }
  0x6f   : > { %664 = vmatprep.mubr.f32.mxu1 %v217_v11  ;;  %v281_v13 = vld [vmem:[%s6113_s30 + $0x208] sm:$0xff]  ;;  %5296 = vmatpush1.bf16.xpose.msra.mxu1 %v5295_v8  ;;  %v474_v20 = vld [vmem:[#allocation5 + $0x410] sm:$0xff]  ;;  %v5425_v21 = vpack.c.bf16 %v539_v18, %v411_v16  ;;  %v216_v25 = vld [vmem:[%s6113_s30] sm:$0xff]  ;;  %s5919_s16 = smov [#allocation8]  }
  0x70   : > { %5422 = vmatprep.subr.bf16.mxu0 %v5421_v7  ;;  %2904 = vmatprep.mubr.f32.mxu0 %v281_v13  ;;  %v410_v22 = vld [vmem:[#allocation5 + $0x210] sm:$0xff]  ;;  %v349_v24 = vld [vmem:[#allocation5 + $0x28] sm:$0xff]  ;;  %v5299_v26 = vpack.c.bf16 %v474_v20, %v346_v19  ;;  %v280_v29 = vld [vmem:[%s6113_s30 + $0x200] sm:$0xff]  ;;  %p5839_p1 = pnand %p5838_p11, %p6317_p0  ;;  %s5841_s8 = sshll.u32 %s5919_s16, 4  ;;  %s5842_s8 = int_to_ptr.vmem [resolvable:$false] %s5841_s8 }
  0x71   : > { %5424 = vmatpush1.bf16.xpose.msra.mxu0 %v5423_v12  ;;  %v538_v23 = vld [vmem:[#allocation5 + $0x610] sm:$0xff]  ;;  %5298 = vmatprep.subr.bf16.mxu1 %v5297_v17  ;;  %v477_v27 = vld [vmem:[#allocation5 + $0x428] sm:$0xff]  ;;  %v219_v32 = vld [vmem:[%s6113_s30 + $0x18] sm:$0xff]  ;;  %s5843_s23 = scalar_lea.vmem %s5842_s8, 256  ;;  %p5844_p5 = scmp.lt.s32.totalorder %s6258_s27, %s5842_s8 }
  0x72   : > { %5426 = vmatprep.subr.bf16.mxu0 %v5425_v21  ;;  %v413_v28 = vld [vmem:[#allocation5 + $0x228] sm:$0xff]  ;;  %v5427_v30 = vpack.c.bf16 %v538_v23, %v410_v22  ;;  %v5301_v33 = vpack.c.bf16 %v477_v27, %v349_v24  ;;  %v283_v34 = vld [vmem:[%s6113_s30 + $0x218] sm:$0xff]  ;;  %v348_v36 = vld [vmem:[#allocation5 + $0x20] sm:$0xff]  ;;  %p5840_p3 = pneg %p5839_p1  ;;  %p5845_p9 = scmp.lt.s32.totalorder %s5843_s23, %s5837_s7 }
  0x73   : > { %v541_v31 = vld [vmem:[#allocation5 + $0x628] sm:$0xff]  ;;  %v476_v37 = vld [vmem:[#allocation5 + $0x420] sm:$0xff]  ;;  %v351_v40 = vld [vmem:[#allocation5 + $0x38] sm:$0xff] }
  0x74   : > { %v5429_v35 = vpack.c.bf16 %v541_v31, %v413_v28  ;;  %v412_v38 = vld [vmem:[#allocation5 + $0x220] sm:$0xff]  ;;  %v479_v41 = vld [vmem:[#allocation5 + $0x438] sm:$0xff]  ;;  %v218_v42 = vld [vmem:[%s6113_s30 + $0x10] sm:$0xff]  ;;  %v5303_v43 = vpack.c.bf16 %v476_v37, %v348_v36  ;;  %p5846_p12 = por %p5845_p9, %p5844_p5 }
  0x75   : > { %v540_v39 = vld [vmem:[#allocation5 + $0x620] sm:$0xff]  ;;  %v415_v44 = vld [vmem:[#allocation5 + $0x238] sm:$0xff]  ;;  %v282_v46 = vld [vmem:[%s6113_s30 + $0x210] sm:$0xff]  ;;  %v5305_v49 = vpack.c.bf16 %v479_v41, %v351_v40 }
  0x76   : > { %665 = vmatmul.mubr.f32.vlgmr.msra.gmra.mrb[0].mxu1 %v216_v25  ;;  %v543_v45 = vld [vmem:[#allocation5 + $0x638] sm:$0xff]  ;;  %v5431_v47 = vpack.c.bf16 %v540_v39, %v412_v38  ;;  %v221_v48 = vld [vmem:[%s6113_s30 + $0x28] sm:$0xff]  ;;  %v350_v52 = vld [vmem:[#allocation5 + $0x30] sm:$0xff]  ;;  %p5847_p2 = pnand %p5846_p12, %p5840_p3 }
  0x77   : > { %5300 = vmatpush1.bf16.xpose.msra.mxu1 %v5299_v26  ;;  %734 = vmatprep.mubr.f32.mxu1 %v219_v32  ;;  %v285_v50 = vld [vmem:[%s6113_s30 + $0x228] sm:$0xff]  ;;  %v5433_v51 = vpack.c.bf16 %v543_v45, %v415_v44  ;;  %v478_v53 = vld [vmem:[#allocation5 + $0x430] sm:$0xff]  ;;  %v220_v58 = vld [vmem:[%s6113_s30 + $0x20] sm:$0xff] }
  0x78   : > { %2905 = vmatmul.mubr.f32.vlgmr.msra.gmra.mrb[0].mxu0 %v280_v29  ;;  %5302 = vmatprep.subr.bf16.mxu1 %v5301_v33  ;;  %v414_v54 = vld [vmem:[#allocation5 + $0x230] sm:$0xff]  ;;  %v353_v56 = vld [vmem:[#allocation5 + $0x48] sm:$0xff]  ;;  %v5307_v59 = vpack.c.bf16 %v478_v53, %v350_v52  ;;  %v284_v62 = vld [vmem:[%s6113_s30 + $0x220] sm:$0xff] }
  0x79   : > { %5428 = vmatpush1.bf16.xpose.msra.mxu0 %v5427_v30  ;;  %2974 = vmatprep.mubr.f32.mxu0 %v283_v34  ;;  %v542_v55 = vld [vmem:[#allocation5 + $0x630] sm:$0xff]  ;;  %v481_v57 = vld [vmem:[#allocation5 + $0x448] sm:$0xff]  ;;  %v223_v0 = vld [vmem:[%s6113_s30 + $0x38] sm:$0xff] }
  0x7a   : > { %5430 = vmatprep.subr.bf16.mxu0 %v5429_v35  ;;  %v417_v60 = vld [vmem:[#allocation5 + $0x248] sm:$0xff]  ;;  %v5435_v63 = vpack.c.bf16 %v542_v55, %v414_v54  ;;  %v5309_v1 = vpack.c.bf16 %v481_v57, %v353_v56  ;;  %v287_v2 = vld [vmem:[%s6113_s30 + $0x238] sm:$0xff]  ;;  %v352_v4 = vld [vmem:[#allocation5 + $0x40] sm:$0xff] }
  0x7b   : > { %v545_v61 = vld [vmem:[#allocation5 + $0x648] sm:$0xff]  ;;  %v480_v5 = vld [vmem:[#allocation5 + $0x440] sm:$0xff]  ;;  %v355_v8 = vld [vmem:[#allocation5 + $0x58] sm:$0xff] }
  0x7c   : > { %v5437_v3 = vpack.c.bf16 %v545_v61, %v417_v60  ;;  %v416_v6 = vld [vmem:[#allocation5 + $0x240] sm:$0xff]  ;;  %v483_v9 = vld [vmem:[#allocation5 + $0x458] sm:$0xff]  ;;  %v222_v10 = vld [vmem:[%s6113_s30 + $0x30] sm:$0xff]  ;;  %v5311_v11 = vpack.c.bf16 %v480_v5, %v352_v4 }
  0x7d   : > { %v544_v7 = vld [vmem:[#allocation5 + $0x640] sm:$0xff]  ;;  %v419_v12 = vld [vmem:[#allocation5 + $0x258] sm:$0xff]  ;;  %v286_v14 = vld [vmem:[%s6113_s30 + $0x230] sm:$0xff]  ;;  %v5313_v17 = vpack.c.bf16 %v483_v9, %v355_v8 }
  0x7e   : > { %735 = vmatmul.mubr.f32.vlgmr.msra.gmra.mrb[0].mxu1 %v218_v42  ;;  %v547_v13 = vld [vmem:[#allocation5 + $0x658] sm:$0xff]  ;;  %v5439_v15 = vpack.c.bf16 %v544_v7, %v416_v6  ;;  %v225_v16 = vld [vmem:[%s6113_s30 + $0x48] sm:$0xff]  ;;  %v354_v20 = vld [vmem:[#allocation5 + $0x50] sm:$0xff] }
  0x7f   : > { %5304 = vmatpush1.bf16.xpose.msra.mxu1 %v5303_v43  ;;  %804 = vmatprep.mubr.f32.mxu1 %v221_v48  ;;  %v289_v18 = vld [vmem:[%s6113_s30 + $0x248] sm:$0xff]  ;;  %v5441_v19 = vpack.c.bf16 %v547_v13, %v419_v12  ;;  %v482_v21 = vld [vmem:[#allocation5 + $0x450] sm:$0xff]  ;;  %v224_v26 = vld [vmem:[%s6113_s30 + $0x40] sm:$0xff] }
  0x80   : > { %2975 = vmatmul.mubr.f32.vlgmr.msra.gmra.mrb[0].mxu0 %v282_v46  ;;  %5306 = vmatprep.subr.bf16.mxu1 %v5305_v49  ;;  %v418_v22 = vld [vmem:[#allocation5 + $0x250] sm:$0xff]  ;;  %v357_v24 = vld [vmem:[#allocation5 + $0x68] sm:$0xff]  ;;  %v5315_v27 = vpack.c.bf16 %v482_v21, %v354_v20  ;;  %v288_v30 = vld [vmem:[%s6113_s30 + $0x240] sm:$0xff] }
  0x81   : > { %5432 = vmatpush1.bf16.xpose.msra.mxu0 %v5431_v47  ;;  %3044 = vmatprep.mubr.f32.mxu0 %v285_v50  ;;  %v546_v23 = vld [vmem:[#allocation5 + $0x650] sm:$0xff]  ;;  %v485_v25 = vld [vmem:[#allocation5 + $0x468] sm:$0xff]  ;;  %v227_v32 = vld [vmem:[%s6113_s30 + $0x58] sm:$0xff] }
  0x82   : > { %5434 = vmatprep.subr.bf16.mxu0 %v5433_v51  ;;  %v421_v28 = vld [vmem:[#allocation5 + $0x268] sm:$0xff]  ;;  %v5443_v31 = vpack.c.bf16 %v546_v23, %v418_v22  ;;  %v5317_v33 = vpack.c.bf16 %v485_v25, %v357_v24  ;;  %v291_v34 = vld [vmem:[%s6113_s30 + $0x258] sm:$0xff]  ;;  %v356_v36 = vld [vmem:[#allocation5 + $0x60] sm:$0xff] }
  0x83   : > { %v549_v29 = vld [vmem:[#allocation5 + $0x668] sm:$0xff]  ;;  %v484_v37 = vld [vmem:[#allocation5 + $0x460] sm:$0xff]  ;;  %v359_v40 = vld [vmem:[#allocation5 + $0x78] sm:$0xff] }
  0x84   : > { %v5445_v35 = vpack.c.bf16 %v549_v29, %v421_v28  ;;  %v420_v38 = vld [vmem:[#allocation5 + $0x260] sm:$0xff]  ;;  %v487_v41 = vld [vmem:[#allocation5 + $0x478] sm:$0xff]  ;;  %v226_v42 = vld [vmem:[%s6113_s30 + $0x50] sm:$0xff]  ;;  %v5319_v43 = vpack.c.bf16 %v484_v37, %v356_v36 }
  0x85   : > { %v548_v39 = vld [vmem:[#allocation5 + $0x660] sm:$0xff]  ;;  %v423_v44 = vld [vmem:[#allocation5 + $0x278] sm:$0xff]  ;;  %v290_v46 = vld [vmem:[%s6113_s30 + $0x250] sm:$0xff]  ;;  %v5321_v49 = vpack.c.bf16 %v487_v41, %v359_v40 }
  0x86   : > { %805 = vmatmul.mubr.f32.vlgmr.msra.gmra.mrb[0].mxu1 %v220_v58  ;;  %v551_v45 = vld [vmem:[#allocation5 + $0x678] sm:$0xff]  ;;  %v5447_v47 = vpack.c.bf16 %v548_v39, %v420_v38  ;;  %v229_v48 = vld [vmem:[%s6113_s30 + $0x68] sm:$0xff]  ;;  %v358_v52 = vld [vmem:[#allocation5 + $0x70] sm:$0xff] }
  0x87   : > { %5308 = vmatpush1.bf16.xpose.msra.mxu1 %v5307_v59  ;;  %874 = vmatprep.mubr.f32.mxu1 %v223_v0  ;;  %v293_v50 = vld [vmem:[%s6113_s30 + $0x268] sm:$0xff]  ;;  %v5449_v51 = vpack.c.bf16 %v551_v45, %v423_v44  ;;  %v486_v53 = vld [vmem:[#allocation5 + $0x470] sm:$0xff]  ;;  %v228_v58 = vld [vmem:[%s6113_s30 + $0x60] sm:$0xff] }
  0x88   : > { %3045 = vmatmul.mubr.f32.vlgmr.msra.gmra.mrb[0].mxu0 %v284_v62  ;;  %5310 = vmatprep.subr.bf16.mxu1 %v5309_v1  ;;  %v422_v54 = vld [vmem:[#allocation5 + $0x270] sm:$0xff]  ;;  %v361_v56 = vld [vmem:[#allocation5 + $0x88] sm:$0xff]  ;;  %v5323_v59 = vpack.c.bf16 %v486_v53, %v358_v52  ;;  %v292_v62 = vld [vmem:[%s6113_s30 + $0x260] sm:$0xff] }
  0x89   : > { %5436 = vmatpush1.bf16.xpose.msra.mxu0 %v5435_v63  ;;  %3114 = vmatprep.mubr.f32.mxu0 %v287_v2  ;;  %v550_v55 = vld [vmem:[#allocation5 + $0x670] sm:$0xff]  ;;  %v489_v57 = vld [vmem:[#allocation5 + $0x488] sm:$0xff]  ;;  %v231_v0 = vld [vmem:[%s6113_s30 + $0x78] sm:$0xff] }
  0x8a   : > { %5438 = vmatprep.subr.bf16.mxu0 %v5437_v3  ;;  %v425_v60 = vld [vmem:[#allocation5 + $0x288] sm:$0xff]  ;;  %v5451_v63 = vpack.c.bf16 %v550_v55, %v422_v54  ;;  %v5325_v1 = vpack.c.bf16 %v489_v57, %v361_v56  ;;  %v295_v2 = vld [vmem:[%s6113_s30 + $0x278] sm:$0xff]  ;;  %v360_v4 = vld [vmem:[#allocation5 + $0x80] sm:$0xff] }
  0x8b   : > { %v553_v61 = vld [vmem:[#allocation5 + $0x688] sm:$0xff]  ;;  %v488_v5 = vld [vmem:[#allocation5 + $0x480] sm:$0xff]  ;;  %v363_v8 = vld [vmem:[#allocation5 + $0x98] sm:$0xff] }
  0x8c   : > { %v5453_v3 = vpack.c.bf16 %v553_v61, %v425_v60  ;;  %v424_v6 = vld [vmem:[#allocation5 + $0x280] sm:$0xff]  ;;  %v491_v9 = vld [vmem:[#allocation5 + $0x498] sm:$0xff]  ;;  %v362_v20 = vld [vmem:[#allocation5 + $0x90] sm:$0xff] }
  0x8d   : > { %v552_v7 = vld [vmem:[#allocation5 + $0x680] sm:$0xff]  ;;  %v427_v12 = vld [vmem:[#allocation5 + $0x298] sm:$0xff]  ;;  %v490_v21 = vld [vmem:[#allocation5 + $0x490] sm:$0xff] }
  0x8e   : > { %875 = vmatmul.mubr.f32.vlgmr.msra.gmra.mrb[0].mxu1 %v222_v10  ;;  %v230_v10 = vld [vmem:[%s6113_s30 + $0x70] sm:$0xff]  ;;  %v555_v13 = vld [vmem:[#allocation5 + $0x698] sm:$0xff]  ;;  %v365_v24 = vld [vmem:[#allocation5 + $0xa8] sm:$0xff] }
  0x8f   : > { %5312 = vmatpush1.bf16.xpose.msra.mxu1 %v5311_v11  ;;  %944 = vmatprep.mubr.f32.mxu1 %v225_v16  ;;  %v5327_v11 = vpack.c.bf16 %v488_v5, %v360_v4  ;;  %v233_v16 = vld [vmem:[%s6113_s30 + $0x88] sm:$0xff]  ;;  %v426_v22 = vld [vmem:[#allocation5 + $0x290] sm:$0xff]  ;;  %v364_v36 = vld [vmem:[#allocation5 + $0xa0] sm:$0xff] }
  0x90   : > { %3115 = vmatmul.mubr.f32.vlgmr.msra.gmra.mrb[0].mxu0 %v286_v14  ;;  %5314 = vmatprep.subr.bf16.mxu1 %v5313_v17  ;;  %v294_v14 = vld [vmem:[%s6113_s30 + $0x270] sm:$0xff]  ;;  %v5329_v17 = vpack.c.bf16 %v491_v9, %v363_v8  ;;  %v493_v25 = vld [vmem:[#allocation5 + $0x4a8] sm:$0xff]  ;;  %v492_v37 = vld [vmem:[#allocation5 + $0x4a0] sm:$0xff] }
  0x91   : > { %5440 = vmatpush1.bf16.xpose.msra.mxu0 %v5439_v15  ;;  %3184 = vmatprep.mubr.f32.mxu0 %v289_v18  ;;  %v5455_v15 = vpack.c.bf16 %v552_v7, %v424_v6  ;;  %v297_v18 = vld [vmem:[%s6113_s30 + $0x288] sm:$0xff]  ;;  %v554_v23 = vld [vmem:[#allocation5 + $0x690] sm:$0xff]  ;;  %v428_v38 = vld [vmem:[#allocation5 + $0x2a0] sm:$0xff] }
  0x92   : > { %5442 = vmatprep.subr.bf16.mxu0 %v5441_v19  ;;  %v5457_v19 = vpack.c.bf16 %v555_v13, %v427_v12  ;;  %v429_v28 = vld [vmem:[#allocation5 + $0x2a8] sm:$0xff]  ;;  %v556_v39 = vld [vmem:[#allocation5 + $0x6a0] sm:$0xff]  ;;  %v367_v40 = vld [vmem:[#allocation5 + $0xb8] sm:$0xff] }
  0x93   : > { %v557_v29 = vld [vmem:[#allocation5 + $0x6a8] sm:$0xff]  ;;  %v495_v41 = vld [vmem:[#allocation5 + $0x4b8] sm:$0xff]  ;;  %v366_v52 = vld [vmem:[#allocation5 + $0xb0] sm:$0xff] }
  0x94   : > { %v431_v44 = vld [vmem:[#allocation5 + $0x2b8] sm:$0xff]  ;;  %v494_v53 = vld [vmem:[#allocation5 + $0x4b0] sm:$0xff]  ;;  %v369_v56 = vld [vmem:[#allocation5 + $0xc8] sm:$0xff] }
  0x95   : > { %v559_v45 = vld [vmem:[#allocation5 + $0x6b8] sm:$0xff]  ;;  %v430_v54 = vld [vmem:[#allocation5 + $0x2b0] sm:$0xff]  ;;  %v497_v57 = vld [vmem:[#allocation5 + $0x4c8] sm:$0xff] }
  0x96   : > { %945 = vmatmul.mubr.f32.vlgmr.msra.gmra.mrb[0].mxu1 %v224_v26  ;;  %v232_v26 = vld [vmem:[%s6113_s30 + $0x80] sm:$0xff]  ;;  %v558_v55 = vld [vmem:[#allocation5 + $0x6b0] sm:$0xff]  ;;  %v433_v60 = vld [vmem:[#allocation5 + $0x2c8] sm:$0xff] }
  0x97   : > { %5316 = vmatpush1.bf16.xpose.msra.mxu1 %v5315_v27  ;;  %1014 = vmatprep.mubr.f32.mxu1 %v227_v32  ;;  %v5331_v27 = vpack.c.bf16 %v490_v21, %v362_v20  ;;  %v235_v32 = vld [vmem:[%s6113_s30 + $0x98] sm:$0xff]  ;;  %v561_v61 = vld [vmem:[#allocation5 + $0x6c8] sm:$0xff]  ;;  %v368_v4 = vld [vmem:[#allocation5 + $0xc0] sm:$0xff] }
  0x98   : > { %3185 = vmatmul.mubr.f32.vlgmr.msra.gmra.mrb[0].mxu0 %v288_v30  ;;  %5318 = vmatprep.subr.bf16.mxu1 %v5317_v33  ;;  %v296_v30 = vld [vmem:[%s6113_s30 + $0x280] sm:$0xff]  ;;  %v5333_v33 = vpack.c.bf16 %v493_v25, %v365_v24  ;;  %v371_v8 = vld [vmem:[#allocation5 + $0xd8] sm:$0xff]  ;;  %v370_v20 = vld [vmem:[#allocation5 + $0xd0] sm:$0xff] }
  0x99   : > { %5444 = vmatpush1.bf16.xpose.msra.mxu0 %v5443_v31  ;;  %3254 = vmatprep.mubr.f32.mxu0 %v291_v34  ;;  %v5459_v31 = vpack.c.bf16 %v554_v23, %v426_v22  ;;  %v299_v34 = vld [vmem:[%s6113_s30 + $0x298] sm:$0xff]  ;;  %v496_v5 = vld [vmem:[#allocation5 + $0x4c0] sm:$0xff]  ;;  %v498_v21 = vld [vmem:[#allocation5 + $0x4d0] sm:$0xff] }
  0x9a   : > { %5446 = vmatprep.subr.bf16.mxu0 %v5445_v35  ;;  %v5461_v35 = vpack.c.bf16 %v557_v29, %v429_v28  ;;  %v432_v6 = vld [vmem:[#allocation5 + $0x2c0] sm:$0xff]  ;;  %v499_v9 = vld [vmem:[#allocation5 + $0x4d8] sm:$0xff]  ;;  %v434_v22 = vld [vmem:[#allocation5 + $0x2d0] sm:$0xff] }
  0x9b   : > { %v560_v7 = vld [vmem:[#allocation5 + $0x6c0] sm:$0xff]  ;;  %v435_v12 = vld [vmem:[#allocation5 + $0x2d8] sm:$0xff]  ;;  %v562_v23 = vld [vmem:[#allocation5 + $0x6d0] sm:$0xff] }
  0x9c   : > { %v563_v13 = vld [vmem:[#allocation5 + $0x6d8] sm:$0xff]  ;;  %v373_v24 = vld [vmem:[#allocation5 + $0xe8] sm:$0xff] }
  0x9d   : > { %v501_v25 = vld [vmem:[#allocation5 + $0x4e8] sm:$0xff] }
  0x9e   : > { %1015 = vmatmul.mubr.f32.vlgmr.msra.gmra.mrb[0].mxu1 %v226_v42  ;;  %v234_v42 = vld [vmem:[%s6113_s30 + $0x90] sm:$0xff]  ;;  %v437_v28 = vld [vmem:[#allocation5 + $0x2e8] sm:$0xff] }
  0x9f   : > { %5320 = vmatpush1.bf16.xpose.msra.mxu1 %v5319_v43  ;;  %1084 = vmatprep.mubr.f32.mxu1 %v229_v48  ;;  %v5335_v43 = vpack.c.bf16 %v492_v37, %v364_v36  ;;  %v237_v48 = vld [vmem:[%s6113_s30 + $0xa8] sm:$0xff]  ;;  %v372_v36 = vld [vmem:[#allocation5 + $0xe0] sm:$0xff] }
  0xa0   : > { %3255 = vmatmul.mubr.f32.vlgmr.msra.gmra.mrb[0].mxu0 %v290_v46  ;;  %5322 = vmatprep.subr.bf16.mxu1 %v5321_v49  ;;  %v298_v46 = vld [vmem:[%s6113_s30 + $0x290] sm:$0xff]  ;;  %v5337_v49 = vpack.c.bf16 %v495_v41, %v367_v40  ;;  %v565_v29 = vld [vmem:[#allocation5 + $0x6e8] sm:$0xff]  ;;  %v500_v37 = vld [vmem:[#allocation5 + $0x4e0] sm:$0xff] }
  0xa1   : > { %5448 = vmatpush1.bf16.xpose.msra.mxu0 %v5447_v47  ;;  %3324 = vmatprep.mubr.f32.mxu0 %v293_v50  ;;  %v5463_v47 = vpack.c.bf16 %v556_v39, %v428_v38  ;;  %v301_v50 = vld [vmem:[%s6113_s30 + $0x2a8] sm:$0xff]  ;;  %v436_v38 = vld [vmem:[#allocation5 + $0x2e0] sm:$0xff]  ;;  %v375_v40 = vld [vmem:[#allocation5 + $0xf8] sm:$0xff] }
  0xa2   : > { %5450 = vmatprep.subr.bf16.mxu0 %v5449_v51  ;;  %v5465_v51 = vpack.c.bf16 %v559_v45, %v431_v44  ;;  %v564_v39 = vld [vmem:[#allocation5 + $0x6e0] sm:$0xff]  ;;  %v503_v41 = vld [vmem:[#allocation5 + $0x4f8] sm:$0xff] }
  0xa3   : > { %v439_v44 = vld [vmem:[#allocation5 + $0x2f8] sm:$0xff] }
  0xa4   : > { %v567_v45 = vld [vmem:[#allocation5 + $0x6f8] sm:$0xff] }
  0xa6   : > { %1085 = vmatmul.mubr.f32.vlgmr.msra.gmra.mrb[0].mxu1 %v228_v58  ;;  %v236_v58 = vld [vmem:[%s6113_s30 + $0xa0] sm:$0xff] }
  0xa7   : > { %5324 = vmatpush1.bf16.xpose.msra.mxu1 %v5323_v59  ;;  %1154 = vmatprep.mubr.f32.mxu1 %v231_v0  ;;  %v5339_v59 = vpack.c.bf16 %v494_v53, %v366_v52  ;;  %v239_v0 = vld [vmem:[%s6113_s30 + $0xb8] sm:$0xff]  ;;  %v374_v52 = vld [vmem:[#allocation5 + $0xf0] sm:$0xff] }
  0xa8   : > { %3325 = vmatmul.mubr.f32.vlgmr.msra.gmra.mrb[0].mxu0 %v292_v62  ;;  %5326 = vmatprep.subr.bf16.mxu1 %v5325_v1  ;;  %v300_v62 = vld [vmem:[%s6113_s30 + $0x2a0] sm:$0xff]  ;;  %v5341_v1 = vpack.c.bf16 %v497_v57, %v369_v56  ;;  %v502_v53 = vld [vmem:[#allocation5 + $0x4f0] sm:$0xff]  ;;  %v377_v56 = vld [vmem:[#allocation5 + $0x108] sm:$0xff] }
  0xa9   : > { %5452 = vmatpush1.bf16.xpose.msra.mxu0 %v5451_v63  ;;  %3394 = vmatprep.mubr.f32.mxu0 %v295_v2  ;;  %v5467_v63 = vpack.c.bf16 %v558_v55, %v430_v54  ;;  %v303_v2 = vld [vmem:[%s6113_s30 + $0x2b8] sm:$0xff]  ;;  %v438_v54 = vld [vmem:[#allocation5 + $0x2f0] sm:$0xff]  ;;  %v505_v57 = vld [vmem:[#allocation5 + $0x508] sm:$0xff] }
  0xaa   : > { %5454 = vmatprep.subr.bf16.mxu0 %v5453_v3  ;;  %v5469_v3 = vpack.c.bf16 %v561_v61, %v433_v60  ;;  %v566_v55 = vld [vmem:[#allocation5 + $0x6f0] sm:$0xff]  ;;  %v441_v60 = vld [vmem:[#allocation5 + $0x308] sm:$0xff] }
  0xab   : > { %v569_v61 = vld [vmem:[#allocation5 + $0x708] sm:$0xff] }
  0xae   : > { %1155 = vmatmul.mubr.f32.vlgmr.msra.gmra.mrb[0].mxu1 %v230_v10  ;;  %v238_v10 = vld [vmem:[%s6113_s30 + $0xb0] sm:$0xff] }
  0xaf   : > { %5328 = vmatpush1.bf16.xpose.msra.mxu1 %v5327_v11  ;;  %1224 = vmatprep.mubr.f32.mxu1 %v233_v16  ;;  %v5343_v11 = vpack.c.bf16 %v496_v5, %v368_v4  ;;  %v241_v16 = vld [vmem:[%s6113_s30 + $0xc8] sm:$0xff]  ;;  %v376_v4 = vld [vmem:[#allocation5 + $0x100] sm:$0xff] }
  0xb0   : > { %3395 = vmatmul.mubr.f32.vlgmr.msra.gmra.mrb[0].mxu0 %v294_v14  ;;  %5330 = vmatprep.subr.bf16.mxu1 %v5329_v17  ;;  %v302_v14 = vld [vmem:[%s6113_s30 + $0x2b0] sm:$0xff]  ;;  %v5345_v17 = vpack.c.bf16 %v499_v9, %v371_v8  ;;  %v504_v5 = vld [vmem:[#allocation5 + $0x500] sm:$0xff]  ;;  %v379_v8 = vld [vmem:[#allocation5 + $0x118] sm:$0xff] }
  0xb1   : > { %5456 = vmatpush1.bf16.xpose.msra.mxu0 %v5455_v15  ;;  %3464 = vmatprep.mubr.f32.mxu0 %v297_v18  ;;  %v5471_v15 = vpack.c.bf16 %v560_v7, %v432_v6  ;;  %v305_v18 = vld [vmem:[%s6113_s30 + $0x2c8] sm:$0xff]  ;;  %v440_v6 = vld [vmem:[#allocation5 + $0x300] sm:$0xff]  ;;  %v507_v9 = vld [vmem:[#allocation5 + $0x518] sm:$0xff] }
  0xb2   : > { %5458 = vmatprep.subr.bf16.mxu0 %v5457_v19  ;;  %v5473_v19 = vpack.c.bf16 %v563_v13, %v435_v12  ;;  %v568_v7 = vld [vmem:[#allocation5 + $0x700] sm:$0xff]  ;;  %v443_v12 = vld [vmem:[#allocation5 + $0x318] sm:$0xff] }
  0xb3   : > { %v571_v13 = vld [vmem:[#allocation5 + $0x718] sm:$0xff] }
  0xb6   : > { %1225 = vmatmul.mubr.f32.vlgmr.msra.gmra.mrb[0].mxu1 %v232_v26  ;;  %v240_v26 = vld [vmem:[%s6113_s30 + $0xc0] sm:$0xff] }
  0xb7   : > { %5332 = vmatpush1.bf16.xpose.msra.mxu1 %v5331_v27  ;;  %1294 = vmatprep.mubr.f32.mxu1 %v235_v32  ;;  %v5347_v27 = vpack.c.bf16 %v498_v21, %v370_v20  ;;  %v243_v32 = vld [vmem:[%s6113_s30 + $0xd8] sm:$0xff]  ;;  %v378_v20 = vld [vmem:[#allocation5 + $0x110] sm:$0xff] }
  0xb8   : > { %3465 = vmatmul.mubr.f32.vlgmr.msra.gmra.mrb[0].mxu0 %v296_v30  ;;  %5334 = vmatprep.subr.bf16.mxu1 %v5333_v33  ;;  %v304_v30 = vld [vmem:[%s6113_s30 + $0x2c0] sm:$0xff]  ;;  %v5349_v33 = vpack.c.bf16 %v501_v25, %v373_v24  ;;  %v506_v21 = vld [vmem:[#allocation5 + $0x510] sm:$0xff]  ;;  %v381_v24 = vld [vmem:[#allocation5 + $0x128] sm:$0xff] }
  0xb9   : > { %5460 = vmatpush1.bf16.xpose.msra.mxu0 %v5459_v31  ;;  %3534 = vmatprep.mubr.f32.mxu0 %v299_v34  ;;  %v5475_v31 = vpack.c.bf16 %v562_v23, %v434_v22  ;;  %v307_v34 = vld [vmem:[%s6113_s30 + $0x2d8] sm:$0xff]  ;;  %v442_v22 = vld [vmem:[#allocation5 + $0x310] sm:$0xff]  ;;  %v509_v25 = vld [vmem:[#allocation5 + $0x528] sm:$0xff] }
  0xba   : > { %5462 = vmatprep.subr.bf16.mxu0 %v5461_v35  ;;  %v5477_v35 = vpack.c.bf16 %v565_v29, %v437_v28  ;;  %v570_v23 = vld [vmem:[#allocation5 + $0x710] sm:$0xff]  ;;  %v445_v28 = vld [vmem:[#allocation5 + $0x328] sm:$0xff] }
  0xbb   : > { %v573_v29 = vld [vmem:[#allocation5 + $0x728] sm:$0xff] }
  0xbe   : > { %1295 = vmatmul.mubr.f32.vlgmr.msra.gmra.mrb[0].mxu1 %v234_v42  ;;  %v242_v42 = vld [vmem:[%s6113_s30 + $0xd0] sm:$0xff] }
  0xbf   : > { %5336 = vmatpush1.bf16.xpose.msra.mxu1 %v5335_v43  ;;  %1364 = vmatprep.mubr.f32.mxu1 %v237_v48  ;;  %v5351_v43 = vpack.c.bf16 %v500_v37, %v372_v36  ;;  %v245_v48 = vld [vmem:[%s6113_s30 + $0xe8] sm:$0xff]  ;;  %v380_v36 = vld [vmem:[#allocation5 + $0x120] sm:$0xff] }
  0xc0   : > { %3535 = vmatmul.mubr.f32.vlgmr.msra.gmra.mrb[0].mxu0 %v298_v46  ;;  %5338 = vmatprep.subr.bf16.mxu1 %v5337_v49  ;;  %v306_v46 = vld [vmem:[%s6113_s30 + $0x2d0] sm:$0xff]  ;;  %v5353_v49 = vpack.c.bf16 %v503_v41, %v375_v40  ;;  %v508_v37 = vld [vmem:[#allocation5 + $0x520] sm:$0xff]  ;;  %v383_v40 = vld [vmem:[#allocation5 + $0x138] sm:$0xff] }
  0xc1   : > { %5464 = vmatpush1.bf16.xpose.msra.mxu0 %v5463_v47  ;;  %3604 = vmatprep.mubr.f32.mxu0 %v301_v50  ;;  %v5479_v47 = vpack.c.bf16 %v564_v39, %v436_v38  ;;  %v309_v50 = vld [vmem:[%s6113_s30 + $0x2e8] sm:$0xff]  ;;  %v444_v38 = vld [vmem:[#allocation5 + $0x320] sm:$0xff]  ;;  %v511_v41 = vld [vmem:[#allocation5 + $0x538] sm:$0xff] }
  0xc2   : > { %5466 = vmatprep.subr.bf16.mxu0 %v5465_v51  ;;  %v5481_v51 = vpack.c.bf16 %v567_v45, %v439_v44  ;;  %v572_v39 = vld [vmem:[#allocation5 + $0x720] sm:$0xff]  ;;  %v447_v44 = vld [vmem:[#allocation5 + $0x338] sm:$0xff] }
  0xc3   : > { %v575_v45 = vld [vmem:[#allocation5 + $0x738] sm:$0xff] }
  0xc6   : > { %1365 = vmatmul.mubr.f32.vlgmr.msra.gmra.mrb[0].mxu1 %v236_v58  ;;  %v244_v58 = vld [vmem:[%s6113_s30 + $0xe0] sm:$0xff] }
  0xc7   : > { %5340 = vmatpush1.bf16.xpose.msra.mxu1 %v5339_v59  ;;  %1434 = vmatprep.mubr.f32.mxu1 %v239_v0  ;;  %v5355_v59 = vpack.c.bf16 %v502_v53, %v374_v52  ;;  %v247_v0 = vld [vmem:[%s6113_s30 + $0xf8] sm:$0xff]  ;;  %v382_v52 = vld [vmem:[#allocation5 + $0x130] sm:$0xff] }
  0xc8   : > { %3605 = vmatmul.mubr.f32.vlgmr.msra.gmra.mrb[0].mxu0 %v300_v62  ;;  %5342 = vmatprep.subr.bf16.mxu1 %v5341_v1  ;;  %v308_v62 = vld [vmem:[%s6113_s30 + $0x2e0] sm:$0xff]  ;;  %v5357_v1 = vpack.c.bf16 %v505_v57, %v377_v56  ;;  %v510_v53 = vld [vmem:[#allocation5 + $0x530] sm:$0xff]  ;;  %v385_v56 = vld [vmem:[#allocation5 + $0x148] sm:$0xff] }
  0xc9   : > { %5468 = vmatpush1.bf16.xpose.msra.mxu0 %v5467_v63  ;;  %3674 = vmatprep.mubr.f32.mxu0 %v303_v2  ;;  %v5483_v63 = vpack.c.bf16 %v566_v55, %v438_v54  ;;  %v311_v2 = vld [vmem:[%s6113_s30 + $0x2f8] sm:$0xff]  ;;  %v446_v54 = vld [vmem:[#allocation5 + $0x330] sm:$0xff]  ;;  %v513_v57 = vld [vmem:[#allocation5 + $0x548] sm:$0xff] }
  0xca   : > { %5470 = vmatprep.subr.bf16.mxu0 %v5469_v3  ;;  %v5485_v3 = vpack.c.bf16 %v569_v61, %v441_v60  ;;  %v574_v55 = vld [vmem:[#allocation5 + $0x730] sm:$0xff]  ;;  %v449_v60 = vld [vmem:[#allocation5 + $0x348] sm:$0xff] }
  0xcb   : > { %v577_v61 = vld [vmem:[#allocation5 + $0x748] sm:$0xff] }
  0xce   : > { %1435 = vmatmul.mubr.f32.vlgmr.msra.gmra.mrb[0].mxu1 %v238_v10  ;;  %v246_v10 = vld [vmem:[%s6113_s30 + $0xf0] sm:$0xff] }
  0xcf   : > { %5344 = vmatpush1.bf16.xpose.msra.mxu1 %v5343_v11  ;;  %1504 = vmatprep.mubr.f32.mxu1 %v241_v16  ;;  %v5359_v11 = vpack.c.bf16 %v504_v5, %v376_v4  ;;  %v249_v16 = vld [vmem:[%s6113_s30 + $0x108] sm:$0xff]  ;;  %v384_v4 = vld [vmem:[#allocation5 + $0x140] sm:$0xff] }
  0xd0   : > { %3675 = vmatmul.mubr.f32.vlgmr.msra.gmra.mrb[0].mxu0 %v302_v14  ;;  %5346 = vmatprep.subr.bf16.mxu1 %v5345_v17  ;;  %v310_v14 = vld [vmem:[%s6113_s30 + $0x2f0] sm:$0xff]  ;;  %v5361_v17 = vpack.c.bf16 %v507_v9, %v379_v8  ;;  %v512_v5 = vld [vmem:[#allocation5 + $0x540] sm:$0xff]  ;;  %v387_v8 = vld [vmem:[#allocation5 + $0x158] sm:$0xff] }
  0xd1   : > { %5472 = vmatpush1.bf16.xpose.msra.mxu0 %v5471_v15  ;;  %3744 = vmatprep.mubr.f32.mxu0 %v305_v18  ;;  %v5487_v15 = vpack.c.bf16 %v568_v7, %v440_v6  ;;  %v313_v18 = vld [vmem:[%s6113_s30 + $0x308] sm:$0xff]  ;;  %v448_v6 = vld [vmem:[#allocation5 + $0x340] sm:$0xff]  ;;  %v515_v9 = vld [vmem:[#allocation5 + $0x558] sm:$0xff] }
  0xd2   : > { %5474 = vmatprep.subr.bf16.mxu0 %v5473_v19  ;;  %v5489_v19 = vpack.c.bf16 %v571_v13, %v443_v12  ;;  %v576_v7 = vld [vmem:[#allocation5 + $0x740] sm:$0xff]  ;;  %v451_v12 = vld [vmem:[#allocation5 + $0x358] sm:$0xff] }
  0xd3   : > { %v579_v13 = vld [vmem:[#allocation5 + $0x758] sm:$0xff] }
  0xd6   : > { %1505 = vmatmul.mubr.f32.vlgmr.msra.gmra.mrb[0].mxu1 %v240_v26  ;;  %v248_v26 = vld [vmem:[%s6113_s30 + $0x100] sm:$0xff] }
  0xd7   : > { %5348 = vmatpush1.bf16.xpose.msra.mxu1 %v5347_v27  ;;  %1574 = vmatprep.mubr.f32.mxu1 %v243_v32  ;;  %v5363_v27 = vpack.c.bf16 %v506_v21, %v378_v20  ;;  %v251_v32 = vld [vmem:[%s6113_s30 + $0x118] sm:$0xff]  ;;  %v386_v20 = vld [vmem:[#allocation5 + $0x150] sm:$0xff] }
  0xd8   : > { %3745 = vmatmul.mubr.f32.vlgmr.msra.gmra.mrb[0].mxu0 %v304_v30  ;;  %5350 = vmatprep.subr.bf16.mxu1 %v5349_v33  ;;  %v312_v30 = vld [vmem:[%s6113_s30 + $0x300] sm:$0xff]  ;;  %v5365_v33 = vpack.c.bf16 %v509_v25, %v381_v24  ;;  %v514_v21 = vld [vmem:[#allocation5 + $0x550] sm:$0xff]  ;;  %v389_v24 = vld [vmem:[#allocation5 + $0x168] sm:$0xff] }
  0xd9   : > { %5476 = vmatpush1.bf16.xpose.msra.mxu0 %v5475_v31  ;;  %3814 = vmatprep.mubr.f32.mxu0 %v307_v34  ;;  %v5491_v31 = vpack.c.bf16 %v570_v23, %v442_v22  ;;  %v315_v34 = vld [vmem:[%s6113_s30 + $0x318] sm:$0xff]  ;;  %v450_v22 = vld [vmem:[#allocation5 + $0x350] sm:$0xff]  ;;  %v517_v25 = vld [vmem:[#allocation5 + $0x568] sm:$0xff] }
  0xda   : > { %5478 = vmatprep.subr.bf16.mxu0 %v5477_v35  ;;  %v5493_v35 = vpack.c.bf16 %v573_v29, %v445_v28  ;;  %v578_v23 = vld [vmem:[#allocation5 + $0x750] sm:$0xff]  ;;  %v453_v28 = vld [vmem:[#allocation5 + $0x368] sm:$0xff] }
  0xdb   : > { %v581_v29 = vld [vmem:[#allocation5 + $0x768] sm:$0xff] }
  0xde   : > { %1575 = vmatmul.mubr.f32.vlgmr.msra.gmra.mrb[0].mxu1 %v242_v42  ;;  %v250_v42 = vld [vmem:[%s6113_s30 + $0x110] sm:$0xff] }
  0xdf   : > { %5352 = vmatpush1.bf16.xpose.msra.mxu1 %v5351_v43  ;;  %1644 = vmatprep.mubr.f32.mxu1 %v245_v48  ;;  %v5367_v43 = vpack.c.bf16 %v508_v37, %v380_v36  ;;  %v253_v48 = vld [vmem:[%s6113_s30 + $0x128] sm:$0xff]  ;;  %v388_v36 = vld [vmem:[#allocation5 + $0x160] sm:$0xff] }
  0xe0   : > { %3815 = vmatmul.mubr.f32.vlgmr.msra.gmra.mrb[0].mxu0 %v306_v46  ;;  %5354 = vmatprep.subr.bf16.mxu1 %v5353_v49  ;;  %v314_v46 = vld [vmem:[%s6113_s30 + $0x310] sm:$0xff]  ;;  %v5369_v49 = vpack.c.bf16 %v511_v41, %v383_v40  ;;  %v516_v37 = vld [vmem:[#allocation5 + $0x560] sm:$0xff]  ;;  %v391_v40 = vld [vmem:[#allocation5 + $0x178] sm:$0xff] }
  0xe1   : > { %5480 = vmatpush1.bf16.xpose.msra.mxu0 %v5479_v47  ;;  %3884 = vmatprep.mubr.f32.mxu0 %v309_v50  ;;  %v5495_v47 = vpack.c.bf16 %v572_v39, %v444_v38  ;;  %v317_v50 = vld [vmem:[%s6113_s30 + $0x328] sm:$0xff]  ;;  %v452_v38 = vld [vmem:[#allocation5 + $0x360] sm:$0xff]  ;;  %v519_v41 = vld [vmem:[#allocation5 + $0x578] sm:$0xff] }
  0xe2   : > { %5482 = vmatprep.subr.bf16.mxu0 %v5481_v51  ;;  %v5497_v51 = vpack.c.bf16 %v575_v45, %v447_v44  ;;  %v580_v39 = vld [vmem:[#allocation5 + $0x760] sm:$0xff]  ;;  %v455_v44 = vld [vmem:[#allocation5 + $0x378] sm:$0xff] }
  0xe3   : > { %v583_v45 = vld [vmem:[#allocation5 + $0x778] sm:$0xff] }
  0xe6   : > { %1645 = vmatmul.mubr.f32.vlgmr.msra.gmra.mrb[0].mxu1 %v244_v58  ;;  %v252_v58 = vld [vmem:[%s6113_s30 + $0x120] sm:$0xff] }
  0xe7   : > { %5356 = vmatpush1.bf16.xpose.msra.mxu1 %v5355_v59  ;;  %1714 = vmatprep.mubr.f32.mxu1 %v247_v0  ;;  %v5371_v59 = vpack.c.bf16 %v510_v53, %v382_v52  ;;  %v255_v0 = vld [vmem:[%s6113_s30 + $0x138] sm:$0xff]  ;;  %v390_v52 = vld [vmem:[#allocation5 + $0x170] sm:$0xff] }
  0xe8   : > { %3885 = vmatmul.mubr.f32.vlgmr.msra.gmra.mrb[0].mxu0 %v308_v62  ;;  %5358 = vmatprep.subr.bf16.mxu1 %v5357_v1  ;;  %v316_v62 = vld [vmem:[%s6113_s30 + $0x320] sm:$0xff]  ;;  %v5373_v1 = vpack.c.bf16 %v513_v57, %v385_v56  ;;  %v518_v53 = vld [vmem:[#allocation5 + $0x570] sm:$0xff]  ;;  %v393_v56 = vld [vmem:[#allocation5 + $0x188] sm:$0xff] }
  0xe9   : > { %5484 = vmatpush1.bf16.xpose.msra.mxu0 %v5483_v63  ;;  %3954 = vmatprep.mubr.f32.mxu0 %v311_v2  ;;  %v5499_v63 = vpack.c.bf16 %v574_v55, %v446_v54  ;;  %v319_v2 = vld [vmem:[%s6113_s30 + $0x338] sm:$0xff]  ;;  %v454_v54 = vld [vmem:[#allocation5 + $0x370] sm:$0xff]  ;;  %v521_v57 = vld [vmem:[#allocation5 + $0x588] sm:$0xff] }
  0xea   : > { %5486 = vmatprep.subr.bf16.mxu0 %v5485_v3  ;;  %v5501_v3 = vpack.c.bf16 %v577_v61, %v449_v60  ;;  %v582_v55 = vld [vmem:[#allocation5 + $0x770] sm:$0xff]  ;;  %v457_v60 = vld [vmem:[#allocation5 + $0x388] sm:$0xff] }
  0xeb   : > { %v585_v61 = vld [vmem:[#allocation5 + $0x788] sm:$0xff] }
  0xee   : > { %1715 = vmatmul.mubr.f32.vlgmr.msra.gmra.mrb[0].mxu1 %v246_v10  ;;  %v254_v10 = vld [vmem:[%s6113_s30 + $0x130] sm:$0xff] }
  0xef   : > { %5360 = vmatpush1.bf16.xpose.msra.mxu1 %v5359_v11  ;;  %1784 = vmatprep.mubr.f32.mxu1 %v249_v16  ;;  %v5375_v11 = vpack.c.bf16 %v512_v5, %v384_v4  ;;  %v257_v16 = vld [vmem:[%s6113_s30 + $0x148] sm:$0xff]  ;;  %v392_v4 = vld [vmem:[#allocation5 + $0x180] sm:$0xff] }
  0xf0   : > { %3955 = vmatmul.mubr.f32.vlgmr.msra.gmra.mrb[0].mxu0 %v310_v14  ;;  %5362 = vmatprep.subr.bf16.mxu1 %v5361_v17  ;;  %v318_v14 = vld [vmem:[%s6113_s30 + $0x330] sm:$0xff]  ;;  %v5377_v17 = vpack.c.bf16 %v515_v9, %v387_v8  ;;  %v520_v5 = vld [vmem:[#allocation5 + $0x580] sm:$0xff]  ;;  %v395_v8 = vld [vmem:[#allocation5 + $0x198] sm:$0xff] }
  0xf1   : > { %5488 = vmatpush1.bf16.xpose.msra.mxu0 %v5487_v15  ;;  %4024 = vmatprep.mubr.f32.mxu0 %v313_v18  ;;  %v5503_v15 = vpack.c.bf16 %v576_v7, %v448_v6  ;;  %v321_v18 = vld [vmem:[%s6113_s30 + $0x348] sm:$0xff]  ;;  %v456_v6 = vld [vmem:[#allocation5 + $0x380] sm:$0xff]  ;;  %v523_v9 = vld [vmem:[#allocation5 + $0x598] sm:$0xff] }
  0xf2   : > { %5490 = vmatprep.subr.bf16.mxu0 %v5489_v19  ;;  %v5505_v19 = vpack.c.bf16 %v579_v13, %v451_v12  ;;  %v584_v7 = vld [vmem:[#allocation5 + $0x780] sm:$0xff]  ;;  %v459_v12 = vld [vmem:[#allocation5 + $0x398] sm:$0xff] }
  0xf3   : > { %v587_v13 = vld [vmem:[#allocation5 + $0x798] sm:$0xff] }
  0xf6   : > { %1785 = vmatmul.mubr.f32.vlgmr.msra.gmra.mrb[0].mxu1 %v248_v26  ;;  %v256_v26 = vld [vmem:[%s6113_s30 + $0x140] sm:$0xff] }
  0xf7   : > { %5364 = vmatpush1.bf16.xpose.msra.mxu1 %v5363_v27  ;;  %1854 = vmatprep.mubr.f32.mxu1 %v251_v32  ;;  %v5379_v27 = vpack.c.bf16 %v514_v21, %v386_v20  ;;  %v259_v32 = vld [vmem:[%s6113_s30 + $0x158] sm:$0xff]  ;;  %v394_v20 = vld [vmem:[#allocation5 + $0x190] sm:$0xff] }
  0xf8   : > { %4025 = vmatmul.mubr.f32.vlgmr.msra.gmra.mrb[0].mxu0 %v312_v30  ;;  %5366 = vmatprep.subr.bf16.mxu1 %v5365_v33  ;;  %v320_v30 = vld [vmem:[%s6113_s30 + $0x340] sm:$0xff]  ;;  %v5381_v33 = vpack.c.bf16 %v517_v25, %v389_v24  ;;  %v522_v21 = vld [vmem:[#allocation5 + $0x590] sm:$0xff]  ;;  %v397_v24 = vld [vmem:[#allocation5 + $0x1a8] sm:$0xff] }
  0xf9   : > { %5492 = vmatpush1.bf16.xpose.msra.mxu0 %v5491_v31  ;;  %4094 = vmatprep.mubr.f32.mxu0 %v315_v34  ;;  %v5507_v31 = vpack.c.bf16 %v578_v23, %v450_v22  ;;  %v323_v34 = vld [vmem:[%s6113_s30 + $0x358] sm:$0xff]  ;;  %v458_v22 = vld [vmem:[#allocation5 + $0x390] sm:$0xff]  ;;  %v525_v25 = vld [vmem:[#allocation5 + $0x5a8] sm:$0xff] }
  0xfa   : > { %5494 = vmatprep.subr.bf16.mxu0 %v5493_v35  ;;  %v5509_v35 = vpack.c.bf16 %v581_v29, %v453_v28  ;;  %v586_v23 = vld [vmem:[#allocation5 + $0x790] sm:$0xff]  ;;  %v461_v28 = vld [vmem:[#allocation5 + $0x3a8] sm:$0xff] }
  0xfb   : > { %v589_v29 = vld [vmem:[#allocation5 + $0x7a8] sm:$0xff] }
  0xfe   : > { %1855 = vmatmul.mubr.f32.vlgmr.msra.gmra.mrb[0].mxu1 %v250_v42  ;;  %v258_v42 = vld [vmem:[%s6113_s30 + $0x150] sm:$0xff] }
  0xff   : > { %5368 = vmatpush1.bf16.xpose.msra.mxu1 %v5367_v43  ;;  %1924 = vmatprep.mubr.f32.mxu1 %v253_v48  ;;  %v5383_v43 = vpack.c.bf16 %v516_v37, %v388_v36  ;;  %v261_v48 = vld [vmem:[%s6113_s30 + $0x168] sm:$0xff]  ;;  %v396_v36 = vld [vmem:[#allocation5 + $0x1a0] sm:$0xff] }
 0x100   : > { %4095 = vmatmul.mubr.f32.vlgmr.msra.gmra.mrb[0].mxu0 %v314_v46  ;;  %5370 = vmatprep.subr.bf16.mxu1 %v5369_v49  ;;  %v322_v46 = vld [vmem:[%s6113_s30 + $0x350] sm:$0xff]  ;;  %v5385_v49 = vpack.c.bf16 %v519_v41, %v391_v40  ;;  %v524_v37 = vld [vmem:[#allocation5 + $0x5a0] sm:$0xff]  ;;  %v399_v40 = vld [vmem:[#allocation5 + $0x1b8] sm:$0xff] }
 0x101   : > { %5496 = vmatpush1.bf16.xpose.msra.mxu0 %v5495_v47  ;;  %4164 = vmatprep.mubr.f32.mxu0 %v317_v50  ;;  %v5511_v47 = vpack.c.bf16 %v580_v39, %v452_v38  ;;  %v325_v50 = vld [vmem:[%s6113_s30 + $0x368] sm:$0xff]  ;;  %v460_v38 = vld [vmem:[#allocation5 + $0x3a0] sm:$0xff]  ;;  %v527_v41 = vld [vmem:[#allocation5 + $0x5b8] sm:$0xff] }
 0x102   : > { %5498 = vmatprep.subr.bf16.mxu0 %v5497_v51  ;;  %v5513_v51 = vpack.c.bf16 %v583_v45, %v455_v44  ;;  %v588_v39 = vld [vmem:[#allocation5 + $0x7a0] sm:$0xff]  ;;  %v463_v44 = vld [vmem:[#allocation5 + $0x3b8] sm:$0xff] }
 0x103   : > { %v591_v45 = vld [vmem:[#allocation5 + $0x7b8] sm:$0xff] }
 0x106   : > { %1925 = vmatmul.mubr.f32.vlgmr.msra.gmra.mrb[0].mxu1 %v252_v58  ;;  %v260_v58 = vld [vmem:[%s6113_s30 + $0x160] sm:$0xff] }
 0x107   : > { %5372 = vmatpush1.bf16.xpose.msra.mxu1 %v5371_v59  ;;  %1994 = vmatprep.mubr.f32.mxu1 %v255_v0  ;;  %v5387_v59 = vpack.c.bf16 %v518_v53, %v390_v52  ;;  %v263_v0 = vld [vmem:[%s6113_s30 + $0x178] sm:$0xff]  ;;  %v398_v52 = vld [vmem:[#allocation5 + $0x1b0] sm:$0xff] }
 0x108   : > { %4165 = vmatmul.mubr.f32.vlgmr.msra.gmra.mrb[0].mxu0 %v316_v62  ;;  %5374 = vmatprep.subr.bf16.mxu1 %v5373_v1  ;;  %v324_v62 = vld [vmem:[%s6113_s30 + $0x360] sm:$0xff]  ;;  %v5389_v1 = vpack.c.bf16 %v521_v57, %v393_v56  ;;  %v526_v53 = vld [vmem:[#allocation5 + $0x5b0] sm:$0xff]  ;;  %v401_v56 = vld [vmem:[#allocation5 + $0x1c8] sm:$0xff] }
 0x109   : > { %5500 = vmatpush1.bf16.xpose.msra.mxu0 %v5499_v63  ;;  %4234 = vmatprep.mubr.f32.mxu0 %v319_v2  ;;  %v5515_v63 = vpack.c.bf16 %v582_v55, %v454_v54  ;;  %v327_v2 = vld [vmem:[%s6113_s30 + $0x378] sm:$0xff]  ;;  %v462_v54 = vld [vmem:[#allocation5 + $0x3b0] sm:$0xff]  ;;  %v529_v57 = vld [vmem:[#allocation5 + $0x5c8] sm:$0xff] }
 0x10a   : > { %5502 = vmatprep.subr.bf16.mxu0 %v5501_v3  ;;  %v5517_v3 = vpack.c.bf16 %v585_v61, %v457_v60  ;;  %v590_v55 = vld [vmem:[#allocation5 + $0x7b0] sm:$0xff]  ;;  %v465_v60 = vld [vmem:[#allocation5 + $0x3c8] sm:$0xff] }
 0x10b   : > { %v593_v61 = vld [vmem:[#allocation5 + $0x7c8] sm:$0xff] }
 0x10e   : > { %1995 = vmatmul.mubr.f32.vlgmr.msra.gmra.mrb[0].mxu1 %v254_v10  ;;  %v262_v10 = vld [vmem:[%s6113_s30 + $0x170] sm:$0xff] }
 0x10f   : > { %5376 = vmatpush1.bf16.xpose.msra.mxu1 %v5375_v11  ;;  %2064 = vmatprep.mubr.f32.mxu1 %v257_v16  ;;  %v5391_v11 = vpack.c.bf16 %v520_v5, %v392_v4  ;;  %v265_v16 = vld [vmem:[%s6113_s30 + $0x188] sm:$0xff]  ;;  %v400_v4 = vld [vmem:[#allocation5 + $0x1c0] sm:$0xff] }
 0x110   : > { %4235 = vmatmul.mubr.f32.vlgmr.msra.gmra.mrb[0].mxu0 %v318_v14  ;;  %5378 = vmatprep.subr.bf16.mxu1 %v5377_v17  ;;  %v326_v14 = vld [vmem:[%s6113_s30 + $0x370] sm:$0xff]  ;;  %v5393_v17 = vpack.c.bf16 %v523_v9, %v395_v8  ;;  %v528_v5 = vld [vmem:[#allocation5 + $0x5c0] sm:$0xff]  ;;  %v403_v8 = vld [vmem:[#allocation5 + $0x1d8] sm:$0xff] }
 0x111   : > { %5504 = vmatpush1.bf16.xpose.msra.mxu0 %v5503_v15  ;;  %4304 = vmatprep.mubr.f32.mxu0 %v321_v18  ;;  %v5519_v15 = vpack.c.bf16 %v584_v7, %v456_v6  ;;  %v329_v18 = vld [vmem:[%s6113_s30 + $0x388] sm:$0xff]  ;;  %v464_v6 = vld [vmem:[#allocation5 + $0x3c0] sm:$0xff]  ;;  %v531_v9 = vld [vmem:[#allocation5 + $0x5d8] sm:$0xff] }
 0x112   : > { %5506 = vmatprep.subr.bf16.mxu0 %v5505_v19  ;;  %v5521_v19 = vpack.c.bf16 %v587_v13, %v459_v12  ;;  %v592_v7 = vld [vmem:[#allocation5 + $0x7c0] sm:$0xff]  ;;  %v467_v12 = vld [vmem:[#allocation5 + $0x3d8] sm:$0xff] }
 0x113   : > { %v595_v13 = vld [vmem:[#allocation5 + $0x7d8] sm:$0xff] }
 0x116   : > { %2065 = vmatmul.mubr.f32.vlgmr.msra.gmra.mrb[0].mxu1 %v256_v26  ;;  %v264_v26 = vld [vmem:[%s6113_s30 + $0x180] sm:$0xff] }
 0x117   : > { %5380 = vmatpush1.bf16.xpose.msra.mxu1 %v5379_v27  ;;  %2134 = vmatprep.mubr.f32.mxu1 %v259_v32  ;;  %v5395_v27 = vpack.c.bf16 %v522_v21, %v394_v20  ;;  %v267_v32 = vld [vmem:[%s6113_s30 + $0x198] sm:$0xff]  ;;  %v402_v20 = vld [vmem:[#allocation5 + $0x1d0] sm:$0xff] }
 0x118   : > { %4305 = vmatmul.mubr.f32.vlgmr.msra.gmra.mrb[0].mxu0 %v320_v30  ;;  %5382 = vmatprep.subr.bf16.mxu1 %v5381_v33  ;;  %v328_v30 = vld [vmem:[%s6113_s30 + $0x380] sm:$0xff]  ;;  %v5397_v33 = vpack.c.bf16 %v525_v25, %v397_v24  ;;  %v530_v21 = vld [vmem:[#allocation5 + $0x5d0] sm:$0xff]  ;;  %v405_v24 = vld [vmem:[#allocation5 + $0x1e8] sm:$0xff] }
 0x119   : > { %5508 = vmatpush1.bf16.xpose.msra.mxu0 %v5507_v31  ;;  %4374 = vmatprep.mubr.f32.mxu0 %v323_v34  ;;  %v5523_v31 = vpack.c.bf16 %v586_v23, %v458_v22  ;;  %v331_v34 = vld [vmem:[%s6113_s30 + $0x398] sm:$0xff]  ;;  %v466_v22 = vld [vmem:[#allocation5 + $0x3d0] sm:$0xff]  ;;  %v533_v25 = vld [vmem:[#allocation5 + $0x5e8] sm:$0xff] }
 0x11a   : > { %5510 = vmatprep.subr.bf16.mxu0 %v5509_v35  ;;  %v5525_v35 = vpack.c.bf16 %v589_v29, %v461_v28  ;;  %v594_v23 = vld [vmem:[#allocation5 + $0x7d0] sm:$0xff]  ;;  %v469_v28 = vld [vmem:[#allocation5 + $0x3e8] sm:$0xff] }
 0x11b   : > { %v597_v29 = vld [vmem:[#allocation5 + $0x7e8] sm:$0xff] }
 0x11e   : > { %2135 = vmatmul.mubr.f32.vlgmr.msra.gmra.mrb[0].mxu1 %v258_v42  ;;  %v266_v42 = vld [vmem:[%s6113_s30 + $0x190] sm:$0xff] }
 0x11f   : > { %5384 = vmatpush1.bf16.xpose.msra.mxu1 %v5383_v43  ;;  %2204 = vmatprep.mubr.f32.mxu1 %v261_v48  ;;  %v5399_v43 = vpack.c.bf16 %v524_v37, %v396_v36  ;;  %v269_v48 = vld [vmem:[%s6113_s30 + $0x1a8] sm:$0xff]  ;;  %v404_v36 = vld [vmem:[#allocation5 + $0x1e0] sm:$0xff] }
 0x120   : > { %4375 = vmatmul.mubr.f32.vlgmr.msra.gmra.mrb[0].mxu0 %v322_v46  ;;  %5386 = vmatprep.subr.bf16.mxu1 %v5385_v49  ;;  %v330_v46 = vld [vmem:[%s6113_s30 + $0x390] sm:$0xff]  ;;  %v5401_v49 = vpack.c.bf16 %v527_v41, %v399_v40  ;;  %v532_v37 = vld [vmem:[#allocation5 + $0x5e0] sm:$0xff]  ;;  %v407_v40 = vld [vmem:[#allocation5 + $0x1f8] sm:$0xff] }
 0x121   : > { %5512 = vmatpush1.bf16.xpose.msra.mxu0 %v5511_v47  ;;  %4444 = vmatprep.mubr.f32.mxu0 %v325_v50  ;;  %v5527_v47 = vpack.c.bf16 %v588_v39, %v460_v38  ;;  %v333_v50 = vld [vmem:[%s6113_s30 + $0x3a8] sm:$0xff]  ;;  %v468_v38 = vld [vmem:[#allocation5 + $0x3e0] sm:$0xff]  ;;  %v535_v41 = vld [vmem:[#allocation5 + $0x5f8] sm:$0xff] }
 0x122   : > { %5514 = vmatprep.subr.bf16.mxu0 %v5513_v51  ;;  %v5529_v51 = vpack.c.bf16 %v591_v45, %v463_v44  ;;  %v596_v39 = vld [vmem:[#allocation5 + $0x7e0] sm:$0xff]  ;;  %v471_v44 = vld [vmem:[#allocation5 + $0x3f8] sm:$0xff] }
 0x123   : > { %v599_v45 = vld [vmem:[#allocation5 + $0x7f8] sm:$0xff] }
 0x126   : > { %2205 = vmatmul.mubr.f32.vlgmr.msra.gmra.mrb[0].mxu1 %v260_v58  ;;  %v268_v58 = vld [vmem:[%s6113_s30 + $0x1a0] sm:$0xff] }
 0x127   : > { %5388 = vmatpush1.bf16.xpose.msra.mxu1 %v5387_v59  ;;  %2274 = vmatprep.mubr.f32.mxu1 %v263_v0  ;;  %v5403_v59 = vpack.c.bf16 %v526_v53, %v398_v52  ;;  %v271_v0 = vld [vmem:[%s6113_s30 + $0x1b8] sm:$0xff]  ;;  %v406_v52 = vld [vmem:[#allocation5 + $0x1f0] sm:$0xff] }
 0x128   : > { %4445 = vmatmul.mubr.f32.vlgmr.msra.gmra.mrb[0].mxu0 %v324_v62  ;;  %5390 = vmatprep.subr.bf16.mxu1 %v5389_v1  ;;  %v332_v62 = vld [vmem:[%s6113_s30 + $0x3a0] sm:$0xff]  ;;  %v5405_v1 = vpack.c.bf16 %v529_v57, %v401_v56  ;;  %v534_v53 = vld [vmem:[#allocation5 + $0x5f0] sm:$0xff] }
 0x129   : > { %5516 = vmatpush1.bf16.xpose.msra.mxu0 %v5515_v63  ;;  %4514 = vmatprep.mubr.f32.mxu0 %v327_v2  ;;  %v5531_v63 = vpack.c.bf16 %v590_v55, %v462_v54  ;;  %v335_v2 = vld [vmem:[%s6113_s30 + $0x3b8] sm:$0xff]  ;;  %v470_v54 = vld [vmem:[#allocation5 + $0x3f0] sm:$0xff]  ;;  %v276_v56 = vld [vmem:[%s6113_s30 + $0x1e0] sm:$0xff]  ;;  %v5419_v57 = vpack.c.bf16 %v534_v53, %v406_v52 }
 0x12a   : > { %5518 = vmatprep.subr.bf16.mxu0 %v5517_v3  ;;  %v5533_v3 = vpack.c.bf16 %v593_v61, %v465_v60  ;;  %v598_v55 = vld [vmem:[#allocation5 + $0x7f0] sm:$0xff]  ;;  %v279_v60 = vld [vmem:[%s6113_s30 + $0x1f8] sm:$0xff] }
 0x12b   : > { %v343_v61 = vld [vmem:[%s6113_s30 + $0x3f8] sm:$0xff] }
 0x12e   : > { %2275 = vmatmul.mubr.f32.vlgmr.msra.gmra.mrb[0].mxu1 %v262_v10  ;;  %v270_v10 = vld [vmem:[%s6113_s30 + $0x1b0] sm:$0xff] }
 0x12f   : > { %5392 = vmatpush1.bf16.xpose.msra.mxu1 %v5391_v11  ;;  %2344 = vmatprep.mubr.f32.mxu1 %v265_v16  ;;  %v5407_v11 = vpack.c.bf16 %v528_v5, %v400_v4  ;;  %v273_v16 = vld [vmem:[%s6113_s30 + $0x1c8] sm:$0xff]  ;;  %v5918_v4 = vmov 0.0  }
 0x130   : > { %4515 = vmatmul.mubr.f32.vlgmr.msra.gmra.mrb[0].mxu0 %v326_v14  ;;  %5394 = vmatprep.subr.bf16.mxu1 %v5393_v17  ;;  %v334_v14 = vld [vmem:[%s6113_s30 + $0x3b0] sm:$0xff]  ;;  %v5409_v17 = vpack.c.bf16 %v531_v9, %v403_v8 }
 0x131   : > { %5520 = vmatpush1.bf16.xpose.msra.mxu0 %v5519_v15  ;;  %4584 = vmatprep.mubr.f32.mxu0 %v329_v18  ;;  %v5535_v15 = vpack.c.bf16 %v592_v7, %v464_v6  ;;  %v337_v18 = vld [vmem:[%s6113_s30 + $0x3c8] sm:$0xff] }
 0x132   : > { %5522 = vmatprep.subr.bf16.mxu0 %v5521_v19  ;;  %v5537_v19 = vpack.c.bf16 %v595_v13, %v467_v12 }
 0x136   : > { %2345 = vmatmul.mubr.f32.vlgmr.msra.gmra.mrb[0].mxu1 %v264_v26  ;;  %v272_v26 = vld [vmem:[%s6113_s30 + $0x1c0] sm:$0xff] }
 0x137   : > { %5396 = vmatpush1.bf16.xpose.msra.mxu1 %v5395_v27  ;;  %2414 = vmatprep.mubr.f32.mxu1 %v267_v32  ;;  %v5411_v27 = vpack.c.bf16 %v530_v21, %v402_v20  ;;  %v275_v32 = vld [vmem:[%s6113_s30 + $0x1d8] sm:$0xff] }
 0x138   : > { %4585 = vmatmul.mubr.f32.vlgmr.msra.gmra.mrb[0].mxu0 %v328_v30  ;;  %5398 = vmatprep.subr.bf16.mxu1 %v5397_v33  ;;  %v336_v30 = vld [vmem:[%s6113_s30 + $0x3c0] sm:$0xff]  ;;  %v5413_v33 = vpack.c.bf16 %v533_v25, %v405_v24 }
 0x139   : > { %5524 = vmatpush1.bf16.xpose.msra.mxu0 %v5523_v31  ;;  %4654 = vmatprep.mubr.f32.mxu0 %v331_v34  ;;  %v5539_v31 = vpack.c.bf16 %v594_v23, %v466_v22  ;;  %v339_v34 = vld [vmem:[%s6113_s30 + $0x3d8] sm:$0xff] }
 0x13a   : > { %5526 = vmatprep.subr.bf16.mxu0 %v5525_v35  ;;  %v5541_v35 = vpack.c.bf16 %v597_v29, %v469_v28 }
 0x13e   : > { %2415 = vmatmul.mubr.f32.vlgmr.msra.gmra.mrb[0].mxu1 %v266_v42  ;;  %v274_v42 = vld [vmem:[%s6113_s30 + $0x1d0] sm:$0xff] }
 0x13f   : > { %5400 = vmatpush1.bf16.xpose.msra.mxu1 %v5399_v43  ;;  %2484 = vmatprep.mubr.f32.mxu1 %v269_v48  ;;  %v5415_v43 = vpack.c.bf16 %v532_v37, %v404_v36  ;;  %v277_v48 = vld [vmem:[%s6113_s30 + $0x1e8] sm:$0xff] }
 0x140   : > { %4655 = vmatmul.mubr.f32.vlgmr.msra.gmra.mrb[0].mxu0 %v330_v46  ;;  %5402 = vmatprep.subr.bf16.mxu1 %v5401_v49  ;;  %v338_v46 = vld [vmem:[%s6113_s30 + $0x3d0] sm:$0xff]  ;;  %v5417_v49 = vpack.c.bf16 %v535_v41, %v407_v40 }
 0x141   : > { %5528 = vmatpush1.bf16.xpose.msra.mxu0 %v5527_v47  ;;  %4724 = vmatprep.mubr.f32.mxu0 %v333_v50  ;;  %v5543_v47 = vpack.c.bf16 %v596_v39, %v468_v38  ;;  %v341_v50 = vld [vmem:[%s6113_s30 + $0x3e8] sm:$0xff] }
 0x142   : > { %5530 = vmatprep.subr.bf16.mxu0 %v5529_v51  ;;  %v5545_v51 = vpack.c.bf16 %v599_v45, %v471_v44 }
 0x146   : > { %2485 = vmatmul.mubr.f32.vlgmr.msra.gmra.mrb[0].mxu1 %v268_v58  ;;  %v340_v58 = vld [vmem:[%s6113_s30 + $0x3e0] sm:$0xff] }
 0x147   : > { %5404 = vmatpush1.bf16.xpose.msra.mxu1 %v5403_v59  ;;  %2554 = vmatprep.mubr.f32.mxu1 %v271_v0  ;;  %v5547_v59 = vpack.c.bf16 %v598_v55, %v470_v54  ;;  %v5081_v0 = vld [vmem:[#allocation7] sm:$0xff] }
 0x148   : > { %4725 = vmatmul.mubr.f32.vlgmr.msra.gmra.mrb[0].mxu0 %v332_v62  ;;  %5406 = vmatprep.subr.bf16.mxu1 %v5405_v1  ;;  %v278_v62 = vld [vmem:[%s6113_s30 + $0x1f0] sm:$0xff]  ;;  %v5082_v1 = vld [vmem:[#allocation7 + $0x8] sm:$0xff] }
 0x149   : > { %5532 = vmatpush1.bf16.xpose.msra.mxu0 %v5531_v63  ;;  %4794 = vmatprep.mubr.f32.mxu0 %v335_v2  ;;  %v342_v63 = vld [vmem:[%s6113_s30 + $0x3f0] sm:$0xff]  ;;  %v5550_v2 = vpack.c.bf16 %v5082_v1, %v5081_v0 }
 0x14a   : > { %5534 = vmatprep.subr.bf16.mxu0 %v5533_v3  ;;  %v5916_v3 = vmov 0.0|0.0  }
 0x14e   : > { %2555 = vmatmul.mubr.f32.vlgmr.msra.gmra.mrb[0].mxu1 %v270_v10 }
 0x14f   : > { %5408 = vmatpush1.bf16.xpose.msra.mxu1 %v5407_v11  ;;  %2624 = vmatprep.mubr.f32.mxu1 %v273_v16 }
 0x150   : > { %4795 = vmatmul.mubr.f32.vlgmr.msra.gmra.mrb[0].mxu0 %v334_v14  ;;  %5410 = vmatprep.subr.bf16.mxu1 %v5409_v17 }
 0x151   : > { %5536 = vmatpush1.bf16.xpose.msra.mxu0 %v5535_v15  ;;  %4864 = vmatprep.mubr.f32.mxu0 %v337_v18 }
 0x152   : > { %5538 = vmatprep.subr.bf16.mxu0 %v5537_v19 }
 0x156   : > { %2625 = vmatmul.mubr.f32.vlgmr.msra.gmra.mrb[0].mxu1 %v272_v26 }
 0x157   : > { %5412 = vmatpush1.bf16.xpose.msra.mxu1 %v5411_v27  ;;  %2694 = vmatprep.mubr.f32.mxu1 %v275_v32 }
 0x158   : > { %4865 = vmatmul.mubr.f32.vlgmr.msra.gmra.mrb[0].mxu0 %v336_v30  ;;  %5414 = vmatprep.subr.bf16.mxu1 %v5413_v33 }
 0x159   : > { %5540 = vmatpush1.bf16.xpose.msra.mxu0 %v5539_v31  ;;  %4934 = vmatprep.mubr.f32.mxu0 %v339_v34 }
 0x15a   : > { %5542 = vmatprep.subr.bf16.mxu0 %v5541_v35 }
 0x15e   : > { %2695 = vmatmul.mubr.f32.vlgmr.msra.gmra.mrb[0].mxu1 %v274_v42 }
 0x15f   : > { %5416 = vmatpush1.bf16.xpose.msra.mxu1 %v5415_v43  ;;  %2764 = vmatprep.mubr.f32.mxu1 %v277_v48 }
 0x160   : > { %4935 = vmatmul.mubr.f32.vlgmr.msra.gmra.mrb[0].mxu0 %v338_v46  ;;  %5418 = vmatprep.subr.bf16.mxu1 %v5417_v49 }
 0x161   : > { %5544 = vmatpush1.bf16.xpose.msra.mxu0 %v5543_v47  ;;  %5004 = vmatprep.mubr.f32.mxu0 %v341_v50 }
 0x162   : > { %5546 = vmatprep.subr.bf16.mxu0 %v5545_v51 }
 0x166   : > { %2765 = vmatmul.mubr.f32.vlgmr.msra.gmra.mrb[0].mxu1 %v276_v56 }
 0x167   : > { %5420 = vmatpush1.bf16.xpose.msra.mxu1 %v5419_v57  ;;  %2834 = vmatprep.mubr.f32.mxu1 %v279_v60 }
 0x168   : > { %5005 = vmatmul.mubr.f32.vlgmr.msra.gmra.mrb[0].mxu0 %v340_v58  ;;  %5549 = vmatprep.subr.bf16.mxu1 %v5916_v3 }
 0x169   : > { %5548 = vmatpush1.bf16.xpose.msra.mxu0 %v5547_v59  ;;  %5074 = vmatprep.mubr.f32.mxu0 %v343_v61 }
 0x16e   : > { %2835 = vmatmul.mubr.f32.vlgmr.msra.gmra.mrb[0].mxu1 %v278_v62 }
 0x16f   : > { %5551 = vmatpush3.bf16.msra.mxu1 %v5550_v2  ;;  %5290 = vmatprep.mubr.msk.f32.mxu1 %vm5917_vm0, %v5918_v4 }
 0x170   : > { %5075 = vmatmul.mubr.f32.vlgmr.msra.gmra.mrb[0].mxu0 %v342_v63 }
 0x241   : > { %v2836_v5 = vpop.f32.mrb[0].mxu1 }
 0x242   : > { %v2838_v7 = vpop.f32.mrb[1].mxu1 }
 0x243   : > { %v5076_v6 = vpop.f32.mrb[0].mxu0 }
 0x244   : > { %v5552_v8 = vadd.f32 %v5076_v6, %v2836_v5  ;;  %v5078_v9 = vpop.f32.mrb[1].mxu0 }
 0x246   : > { %v5080_v10 = vmax.f32 %v5552_v8, 0.0 }
 0x248   : > { %5291 = vmatmul.mubr.msk.f32.vlgmr.msra.gmra.mrb[2].mxu1 %vm5083_vm1, %v5080_v10 }
 0x31b   : > { %v5153_v11 = vpop.f32.mrb[2].mxu1 }
 0x31c   : > { %v5154_v12 = vadd.f32 3.0, %v5153_v11  ;;  %v5292_v13 = vpop.f32.mrb[3].mxu1 }
 0x31e   : > { %v5157_v14 = vmax.f32 %v5154_v12, 0.0 }
 0x320   : > { %v5158_v15 = vmin.f32 %v5157_v14, 6.0 }
 0x322   : > { %v5159_v16 = vmul.f32 0.16666667, %v5158_v15 }
 0x324   : > { %5160 = vst [vmem:[%s215_s24] sm:$0xff] %v5159_v16 }
 0x325   : > { %5850 = shalt.err (!%p5847_p2)
}
 0x326   : > { %s5851_s11 = scalar_lea.hbm %s6256_s4, 128  ;;  %s5855_s21 = scalar_lea.hbm %s6303_s3, 256 }
 0x327   : > { %p5852_p13 = scmp.ne.s32.totalorder %s6256_s4, %s5851_s11  ;;  %p5856_p4 = scmp.lt.u32.totalorder %s6256_s4, %s6303_s3 }
 0x328   : > { %p5857_p7 = scmp.lt.u32.totalorder %s5855_s21, %s5851_s11  ;;  %p5859_p11 = scmp.lt.u32.totalorder %s5851_s11, %s6256_s4 }
 0x329   : > { %p5853_p6 = pnand %p5852_p13, %p6317_p0 }
 0x32a   : > { %p5858_p8 = por %p5857_p7, %p5856_p4 }
 0x32b   : > { %p5854_p10 = pneg %p5853_p6 }
 0x32c   : > { %p5860_p1 = por %p5859_p11, %p5858_p8 }
 0x32e   : > { %p5861_p3 = pnand %p5860_p1, %p5854_p10 }
 0x330   : > { %5864 = shalt.err (!%p5861_p3)
}
 0x331   : > { %5687 = dma.vmem_to_hbm [thread:$0]  (%p6317_p0), %s6258_s27, 128, %s6256_s4, %s5162_s5  }
 0x332 PF: > { %s5187_s30 = sand.u32 1, %s5895_s12   ;;  %p6318_p5 = scmp.ne.s32.totalorder %s6308_s19, 0 }
 0x333   : > { %p6319_p9 = scmp.ge.s32.totalorder %s5907_s15, 2  ;;  %s5188_s18 = scalar_lea.sflag [#allocation4], %s5187_s30 }
 0x335   : > { %p5701_p12 = pnand %p6319_p9, %p6318_p5 }
 0x337   : > { %5890 = dma.done.wait (!%p5701_p12), %s5188_s18, 128  }
 0x338   : > { %5892 = vsyncadd (!%p5701_p12), %s5188_s18, 4294967168  ;;  %p17_p2 = scmp.ge.s32.totalorder %s6050_s6, 4   ;;  %s6320_s12 = smov %s5899_s13 }
 0x339   : > { %s6321_s13 = smov %s5903_s14  ;;  %s6322_s14 = smov %s6059_s9 }
 0x33a   : > { %s6323_s15 = smov %s6050_s6  ;;  %19 = sbr.rel (!%p17_p2) target bundleno = 6 (0x6), region = 85 }
 0x341   :  { %5193 = vsyncpa [#allocation3], 1 }
 0x342   :  { %5195 = vsyncpa [#allocation3 + $0x1], 1 }
 0x343   :  { %5196 = vsyncpa [#allocation6], 1 }
 0x344   :  { %5197 = vsyncpa [#allocation4], 1 }
 0x345   :  { %5199 = vsyncpa [#allocation4 + $0x1], 1 }

</bundles_post_ra>
